<compile_context>
chip_gen: v5e
topology: v5e:2x2
jax: 0.10.0
libtpu: 0.0.40
codegen_flags: <defaults>
</compile_context>

<pallas_src>
from functools import partial

import jax
import jax.numpy as jnp
from jax.experimental import pallas as pl
from jax.experimental.pallas import tpu as pltpu


def _dfc_kernel(mag_ref, ph_ref, gamma_ref, beta_ref, out_ref,
                *, F, mic_pairs, eps, ln_eps, use_sin):
    # mag_ref : [1, 1, F, TK]  magnitude at lps_channel (selected via index_map)
    # ph_ref  : [1, M, F, TK]  all mic phases
    # gamma_ref / beta_ref : [F, 1] LayerNorm affine params (resident)
    # out_ref : [1, D, TK]
    mag = mag_ref[0, 0].astype(jnp.float32)              # [F, TK]
    lps = jnp.log(mag * mag + eps)                       # [F, TK]

    # ChannelWiseLayerNorm == LayerNorm over F for every frame (biased var).
    mean = jnp.mean(lps, axis=0, keepdims=True)          # [1, TK]
    centered = lps - mean
    var = jnp.mean(centered * centered, axis=0, keepdims=True)
    norm = centered * jax.lax.rsqrt(var + ln_eps)        # [F, TK]
    g = gamma_ref[...].astype(jnp.float32)               # [F, 1] (broadcast over K)
    b = beta_ref[...].astype(jnp.float32)
    out_ref[0, 0:F, :] = (norm * g + b).astype(out_ref.dtype)

    I = len(mic_pairs)
    # Static Python loop over compile-time mic pairs: per-pair [F, TK] tile
    # stores, no reshape / cross-sublane movement.
    for i, (l, r) in enumerate(mic_pairs):
        diff = ph_ref[0, l].astype(jnp.float32) - ph_ref[0, r].astype(jnp.float32)
        out_ref[0, F + i * F:F + (i + 1) * F, :] = jnp.cos(diff).astype(out_ref.dtype)
        if use_sin:
            off = F + (I + i) * F
            out_ref[0, off:off + F, :] = jnp.sin(diff).astype(out_ref.dtype)


def _choose_tile_k(K, M, F, D, in_itemsize, out_itemsize,
                   budget_bytes=24 * 1024 * 1024):
    """Pick a lane-dense K tile (multiple of 128) whose double-buffered blocks
    fit the VMEM budget; fall back to a full-K block for tiny K."""
    if K <= 256:
        return K
    for tk in (4096, 2048, 1024, 512, 256, 128):
        if tk > K:
            continue
        per_step = 2 * ((M + 1) * F * tk * in_itemsize + D * tk * out_itemsize)
        if per_step <= budget_bytes:
            return tk
    return 128


def directional_feature_computer(magnitude, phase, real, imag, gamma, beta, *,
                                 lps_channel, mic_pairs,
                                 input_features=("LPS", "IPD"),
                                 use_cos_IPD=True, use_sin_IPD=False,
                                 eps=1e-8, ln_eps=1e-5):
    """Pallas implementation of DirectionalFeatureComputer.forward.

    real / imag are accepted (to mirror the PyTorch signature) but unused,
    exactly as in the reference module.
    """
    del real, imag
    assert "LPS" in input_features and "IPD" in input_features
    B, M, F, K = magnitude.shape
    mic_pairs = tuple((int(p[0]), int(p[1])) for p in mic_pairs)
    I = len(mic_pairs)
    D = F + I * F * (2 if use_sin_IPD else 1)
    out_dtype = magnitude.dtype

    in_itemsize = jnp.dtype(magnitude.dtype).itemsize
    out_itemsize = jnp.dtype(out_dtype).itemsize
    TK = _choose_tile_k(K, M, F, D, in_itemsize, out_itemsize)
    grid = (B, pl.cdiv(K, TK))

    g = gamma.reshape(F, 1)
    b = beta.reshape(F, 1)

    kernel = partial(_dfc_kernel, F=F, mic_pairs=mic_pairs,
                     eps=eps, ln_eps=ln_eps, use_sin=use_sin_IPD)

    return pl.pallas_call(
        kernel,
        out_shape=jax.ShapeDtypeStruct((B, D, K), out_dtype),
        grid=grid,
        in_specs=[
            # Select the LPS channel directly via the index_map (no wrapper slice).
            pl.BlockSpec((1, 1, F, TK),
                         lambda bi, kt, c=lps_channel: (bi, c, 0, kt)),
            # All mic channels in one block; pairs indexed statically in-kernel.
            pl.BlockSpec((1, M, F, TK), lambda bi, kt: (bi, 0, 0, kt)),
            # gamma/beta stay VMEM-resident across the grid.
            pl.BlockSpec((F, 1), lambda bi, kt: (0, 0)),
            pl.BlockSpec((F, 1), lambda bi, kt: (0, 0)),
        ],
        out_specs=pl.BlockSpec((1, D, TK), lambda bi, kt: (bi, 0, kt)),
        compiler_params=pltpu.CompilerParams(
            dimension_semantics=("parallel", "parallel"),
            vmem_limit_bytes=32 * 1024 * 1024),
    )(magnitude, phase, g, b)


def reference_dfc(magnitude, phase, gamma, beta, *, lps_channel, mic_pairs,
                  use_sin_IPD=False, eps=1e-8, ln_eps=1e-5):
    """Pure-JAX reference matching the PyTorch forward semantics."""
    B, M, F, K = magnitude.shape
    left = jnp.array([p[0] for p in mic_pairs])
    right = jnp.array([p[1] for p in mic_pairs])

    lps = jnp.log(magnitude[:, lps_channel] ** 2 + eps)          # [B, F, K]
    x = jnp.transpose(lps, (0, 2, 1))                            # [B, K, F]
    mean = x.mean(-1, keepdims=True)
    var = ((x - mean) ** 2).mean(-1, keepdims=True)
    x = (x - mean) / jnp.sqrt(var + ln_eps) * gamma + beta
    lps_n = jnp.transpose(x, (0, 2, 1))                          # [B, F, K]

    diff = jnp.take(phase, left, axis=1) - jnp.take(phase, right, axis=1)
    cos_ipd = jnp.cos(diff).reshape(B, -1, K)
    feats = [lps_n, cos_ipd]
    if use_sin_IPD:
        feats.append(jnp.sin(diff).reshape(B, -1, K))
    return jnp.concatenate(feats, axis=1)


if __name__ == "__main__":
    # Small synthetic config consistent with the module:
    #   n_fft=30 -> num_freqs F = 16, K = 8 frames, M = 4 mics, B = 2.
    n_fft, win_length, hop_length = 30, 30, 15
    B, M, K = 2, 4, 8
    F = n_fft // 2 + 1
    mic_pairs = [(0, 1), (0, 2), (1, 3)]
    lps_channel = 0

    key = jax.random.PRNGKey(0)
    k_mag, k_ph = jax.random.split(key)
    magnitude = jax.random.uniform(k_mag, (B, M, F, K), jnp.float32,
                                   minval=0.05, maxval=2.0)
    phase = jax.random.uniform(k_ph, (B, M, F, K), jnp.float32,
                               minval=-jnp.pi, maxval=jnp.pi)
    real = magnitude * jnp.cos(phase)   # unused by forward (kept for signature)
    imag = magnitude * jnp.sin(phase)   # unused by forward

    # Deterministic LayerNorm affine parameters (synthetic, not a checkpoint).
    gamma = 1.0 + 0.01 * jnp.arange(F, dtype=jnp.float32)
    beta = 0.001 * jnp.arange(F, dtype=jnp.float32)

    # cos-IPD only (module default).
    out = directional_feature_computer(
        magnitude, phase, real, imag, gamma, beta,
        lps_channel=lps_channel, mic_pairs=mic_pairs, use_sin_IPD=False)
    out = jax.block_until_ready(out)
    ref = reference_dfc(magnitude, phase, gamma, beta,
                        lps_channel=lps_channel, mic_pairs=mic_pairs,
                        use_sin_IPD=False)
    assert out.shape == (B, F + len(mic_pairs) * F, K), out.shape
    assert jnp.allclose(out, ref, rtol=1e-5, atol=1e-5), (
        float(jnp.max(jnp.abs(out - ref))))

    # cos + sin IPD variant.
    out_s = directional_feature_computer(
        magnitude, phase, real, imag, gamma, beta,
        lps_channel=lps_channel, mic_pairs=mic_pairs, use_sin_IPD=True)
    out_s = jax.block_until_ready(out_s)
    ref_s = reference_dfc(magnitude, phase, gamma, beta,
                          lps_channel=lps_channel, mic_pairs=mic_pairs,
                          use_sin_IPD=True)
    assert out_s.shape == (B, F + 2 * len(mic_pairs) * F, K), out_s.shape
    assert jnp.allclose(out_s, ref_s, rtol=1e-5, atol=1e-5), (
        float(jnp.max(jnp.abs(out_s - ref_s))))

    print("KERNEL_OK")
</pallas_src>

<mosaic_0001>
module attributes {stable_mosaic.version = 11 : i64} {
  func.func @_dfc_kernel(%arg0: i32, %arg1: i32, %arg2: memref<1x1x16x8xf32, #tpu.memory_space<vmem>>, %arg3: memref<1x4x16x8xf32, #tpu.memory_space<vmem>>, %arg4: memref<16x1xf32, #tpu.memory_space<vmem>>, %arg5: memref<16x1xf32, #tpu.memory_space<vmem>>, %arg6: memref<1x64x8xf32, #tpu.memory_space<vmem>>) attributes {dimension_semantics = [#tpu.dimension_semantics<parallel>, #tpu.dimension_semantics<parallel>], iteration_bounds = array<i64: 2, 1>, scalar_prefetch = 0 : i64, scratch_operands = 0 : i64, tpu.core_type = #tpu.core_type<tc>, window_params = [{transform_indices = @transform_0, window_bounds = array<i64: 1, 1, 16, 8>}, {transform_indices = @transform_1, window_bounds = array<i64: 1, 4, 16, 8>}, {pipeline_mode = #tpu.pipeline_mode<synchronous>, transform_indices = @transform_2, window_bounds = array<i64: 16, 1>}, {pipeline_mode = #tpu.pipeline_mode<synchronous>, transform_indices = @transform_3, window_bounds = array<i64: 16, 1>}, {transform_indices = @transform_4, window_bounds = array<i64: 1, 64, 8>}]} {
    %c0 = arith.constant 0 : index
    %c0_0 = arith.constant 0 : index
    %c0_1 = arith.constant 0 : index
    %c0_2 = arith.constant 0 : index
    %0 = vector.load %arg2[%c0, %c0_0, %c0_1, %c0_2] : memref<1x1x16x8xf32, #tpu.memory_space<vmem>>, vector<1x1x16x8xf32>
    %1 = vector.shape_cast %0 : vector<1x1x16x8xf32> to vector<16x8xf32>
    %2 = arith.mulf %1, %1 : vector<16x8xf32>
    %cst = arith.constant 9.99999993E-9 : f32
    %3 = vector.broadcast %cst : f32 to vector<16x8xf32>
    %4 = arith.addf %2, %3 : vector<16x8xf32>
    %5 = math.log %4 : vector<16x8xf32>
    %cst_3 = arith.constant dense<0.000000e+00> : vector<8xf32>
    %6 = vector.multi_reduction <add>, %5, %cst_3 [0] : vector<16x8xf32> to vector<8xf32>
    %7 = vector.shape_cast %6 : vector<8xf32> to vector<1x8xf32>
    %cst_4 = arith.constant 1.600000e+01 : f32
    %8 = vector.broadcast %cst_4 : f32 to vector<1x8xf32>
    %9 = arith.divf %7, %8 : vector<1x8xf32>
    %10 = vector.broadcast %9 : vector<1x8xf32> to vector<16x8xf32>
    %11 = arith.subf %5, %10 : vector<16x8xf32>
    %12 = arith.mulf %11, %11 : vector<16x8xf32>
    %cst_5 = arith.constant dense<0.000000e+00> : vector<8xf32>
    %13 = vector.multi_reduction <add>, %12, %cst_5 [0] : vector<16x8xf32> to vector<8xf32>
    %14 = vector.shape_cast %13 : vector<8xf32> to vector<1x8xf32>
    %cst_6 = arith.constant 1.600000e+01 : f32
    %15 = vector.broadcast %cst_6 : f32 to vector<1x8xf32>
    %16 = arith.divf %14, %15 : vector<1x8xf32>
    %cst_7 = arith.constant 9.99999974E-6 : f32
    %17 = vector.broadcast %cst_7 : f32 to vector<1x8xf32>
    %18 = arith.addf %16, %17 : vector<1x8xf32>
    %19 = math.rsqrt %18 : vector<1x8xf32>
    %20 = vector.broadcast %19 : vector<1x8xf32> to vector<16x8xf32>
    %21 = arith.mulf %11, %20 : vector<16x8xf32>
    %c0_8 = arith.constant 0 : index
    %c0_9 = arith.constant 0 : index
    %22 = vector.load %arg4[%c0_8, %c0_9] : memref<16x1xf32, #tpu.memory_space<vmem>>, vector<16x1xf32>
    %c0_10 = arith.constant 0 : index
    %c0_11 = arith.constant 0 : index
    %23 = vector.load %arg5[%c0_10, %c0_11] : memref<16x1xf32, #tpu.memory_space<vmem>>, vector<16x1xf32>
    %24 = vector.broadcast %22 : vector<16x1xf32> to vector<16x8xf32>
    %25 = arith.mulf %21, %24 : vector<16x8xf32>
    %26 = vector.broadcast %23 : vector<16x1xf32> to vector<16x8xf32>
    %27 = arith.addf %25, %26 : vector<16x8xf32>
    %c0_12 = arith.constant 0 : index
    %c0_13 = arith.constant 0 : index
    %c0_14 = arith.constant 0 : index
    %28 = vector.load %arg6[%c0_12, %c0_13, %c0_14] : memref<1x64x8xf32, #tpu.memory_space<vmem>>, vector<1x16x8xf32>
    %29 = vector.shape_cast %28 : vector<1x16x8xf32> to vector<16x8xf32>
    %30 = vector.shape_cast %27 : vector<16x8xf32> to vector<1x16x8xf32>
    tpu.vector_store %arg6[%c0_12, %c0_13, %c0_14], %30 {strides = array<i32>} : memref<1x64x8xf32, #tpu.memory_space<vmem>>, vector<1x16x8xf32>,
    %c0_15 = arith.constant 0 : index
    %c0_16 = arith.constant 0 : index
    %c0_17 = arith.constant 0 : index
    %c0_18 = arith.constant 0 : index
    %31 = vector.load %arg3[%c0_15, %c0_16, %c0_17, %c0_18] : memref<1x4x16x8xf32, #tpu.memory_space<vmem>>, vector<1x1x16x8xf32>
    %32 = vector.shape_cast %31 : vector<1x1x16x8xf32> to vector<16x8xf32>
    %c0_19 = arith.constant 0 : index
    %c1 = arith.constant 1 : index
    %c0_20 = arith.constant 0 : index
    %c0_21 = arith.constant 0 : index
    %33 = vector.load %arg3[%c0_19, %c1, %c0_20, %c0_21] : memref<1x4x16x8xf32, #tpu.memory_space<vmem>>, vector<1x1x16x8xf32>
    %34 = vector.shape_cast %33 : vector<1x1x16x8xf32> to vector<16x8xf32>
    %35 = arith.subf %32, %34 : vector<16x8xf32>
    %36 = math.cos %35 : vector<16x8xf32>
    %c0_22 = arith.constant 0 : index
    %c16 = arith.constant 16 : index
    %c0_23 = arith.constant 0 : index
    %37 = vector.load %arg6[%c0_22, %c16, %c0_23] : memref<1x64x8xf32, #tpu.memory_space<vmem>>, vector<1x16x8xf32>
    %38 = vector.shape_cast %37 : vector<1x16x8xf32> to vector<16x8xf32>
    %39 = vector.shape_cast %36 : vector<16x8xf32> to vector<1x16x8xf32>
    tpu.vector_store %arg6[%c0_22, %c16, %c0_23], %39 {strides = array<i32>} : memref<1x64x8xf32, #tpu.memory_space<vmem>>, vector<1x16x8xf32>,
    %c0_24 = arith.constant 0 : index
    %c0_25 = arith.constant 0 : index
    %c0_26 = arith.constant 0 : index
    %c0_27 = arith.constant 0 : index
    %40 = vector.load %arg3[%c0_24, %c0_25, %c0_26, %c0_27] : memref<1x4x16x8xf32, #tpu.memory_space<vmem>>, vector<1x1x16x8xf32>
    %41 = vector.shape_cast %40 : vector<1x1x16x8xf32> to vector<16x8xf32>
    %c0_28 = arith.constant 0 : index
    %c2 = arith.constant 2 : index
    %c0_29 = arith.constant 0 : index
    %c0_30 = arith.constant 0 : index
    %42 = vector.load %arg3[%c0_28, %c2, %c0_29, %c0_30] : memref<1x4x16x8xf32, #tpu.memory_space<vmem>>, vector<1x1x16x8xf32>
    %43 = vector.shape_cast %42 : vector<1x1x16x8xf32> to vector<16x8xf32>
    %44 = arith.subf %41, %43 : vector<16x8xf32>
    %45 = math.cos %44 : vector<16x8xf32>
    %c0_31 = arith.constant 0 : index
    %c32 = arith.constant 32 : index
    %c0_32 = arith.constant 0 : index
    %46 = vector.load %arg6[%c0_31, %c32, %c0_32] : memref<1x64x8xf32, #tpu.memory_space<vmem>>, vector<1x16x8xf32>
    %47 = vector.shape_cast %46 : vector<1x16x8xf32> to vector<16x8xf32>
    %48 = vector.shape_cast %45 : vector<16x8xf32> to vector<1x16x8xf32>
    tpu.vector_store %arg6[%c0_31, %c32, %c0_32], %48 {strides = array<i32>} : memref<1x64x8xf32, #tpu.memory_space<vmem>>, vector<1x16x8xf32>,
    %c0_33 = arith.constant 0 : index
    %c1_34 = arith.constant 1 : index
    %c0_35 = arith.constant 0 : index
    %c0_36 = arith.constant 0 : index
    %49 = vector.load %arg3[%c0_33, %c1_34, %c0_35, %c0_36] : memref<1x4x16x8xf32, #tpu.memory_space<vmem>>, vector<1x1x16x8xf32>
    %50 = vector.shape_cast %49 : vector<1x1x16x8xf32> to vector<16x8xf32>
    %c0_37 = arith.constant 0 : index
    %c3 = arith.constant 3 : index
    %c0_38 = arith.constant 0 : index
    %c0_39 = arith.constant 0 : index
    %51 = vector.load %arg3[%c0_37, %c3, %c0_38, %c0_39] : memref<1x4x16x8xf32, #tpu.memory_space<vmem>>, vector<1x1x16x8xf32>
    %52 = vector.shape_cast %51 : vector<1x1x16x8xf32> to vector<16x8xf32>
    %53 = arith.subf %50, %52 : vector<16x8xf32>
    %54 = math.cos %53 : vector<16x8xf32>
    %c0_40 = arith.constant 0 : index
    %c48 = arith.constant 48 : index
    %c0_41 = arith.constant 0 : index
    %55 = vector.load %arg6[%c0_40, %c48, %c0_41] : memref<1x64x8xf32, #tpu.memory_space<vmem>>, vector<1x16x8xf32>
    %56 = vector.shape_cast %55 : vector<1x16x8xf32> to vector<16x8xf32>
    %57 = vector.shape_cast %54 : vector<16x8xf32> to vector<1x16x8xf32>
    tpu.vector_store %arg6[%c0_40, %c48, %c0_41], %57 {strides = array<i32>} : memref<1x64x8xf32, #tpu.memory_space<vmem>>, vector<1x16x8xf32>,
    return
  }
  func.func @transform_0(%arg0: i32, %arg1: i32) -> (i32, i32, i32, i32) {
    %c0_i32 = arith.constant 0 : i32
    %c0_i32_0 = arith.constant 0 : i32
    %c0_i32_1 = arith.constant 0 : i32
    return %arg0, %c0_i32, %c0_i32_0, %arg1 : i32, i32, i32, i32
  }
  func.func @transform_1(%arg0: i32, %arg1: i32) -> (i32, i32, i32, i32) {
    %c0_i32 = arith.constant 0 : i32
    %c0_i32_0 = arith.constant 0 : i32
    %c0_i32_1 = arith.constant 0 : i32
    return %arg0, %c0_i32, %c0_i32_0, %arg1 : i32, i32, i32, i32
  }
  func.func @transform_2(%arg0: i32, %arg1: i32) -> (i32, i32) {
    %c0_i32 = arith.constant 0 : i32
    %c0_i32_0 = arith.constant 0 : i32
    %c0_i32_1 = arith.constant 0 : i32
    return %c0_i32, %c0_i32_0 : i32, i32
  }
  func.func @transform_3(%arg0: i32, %arg1: i32) -> (i32, i32) {
    %c0_i32 = arith.constant 0 : i32
    %c0_i32_0 = arith.constant 0 : i32
    %c0_i32_1 = arith.constant 0 : i32
    return %c0_i32, %c0_i32_0 : i32, i32
  }
  func.func @transform_4(%arg0: i32, %arg1: i32) -> (i32, i32, i32) {
    %c0_i32 = arith.constant 0 : i32
    %c0_i32_0 = arith.constant 0 : i32
    return %arg0, %c0_i32, %arg1 : i32, i32, i32
  }
}

</mosaic_0001>

<bundles_post_ra>
// kernel: tpu_custom_call.1
= control target key start
LH: loop header
LB: loop body
LE: loop exit
PB: predicated region body
PF: predicated region fallthrough
CT: control target
= control target key end

     0   :  { %s1538_s15 = smov 0   ;;  %s1540_s16 = smov 0   ;;  %s2308_s0 = inlined_call_operand.vmem [shape: f32[2,4,16,8], index: 0, kind: input, shape index: {}]   ;;  %s2309_s1 = inlined_call_operand.vmem [shape: f32[2,4,16,8], index: 1, kind: input, shape index: {}]   ;;  %s2310_s2 = inlined_call_operand.vmem [shape: f32[16,1], index: 2, kind: input, shape index: {}]   ;;  %s2311_s3 = inlined_call_operand.vmem [shape: f32[16,1], index: 3, kind: input, shape index: {}]   ;;  %s2312_s4 = inlined_call_operand.vmem [shape: f32[2,64,8], index: 4, kind: output, shape index: {}]  }
   0x1   :  { %s1542_s17 = smov 0  }
   0x2 LB: > { %s26_s18 = sadd.s32 1, %s1499_s16  ;;  %p1401_p0 = scmp.ge.s32.totalorder %s1503_s17, 1  ;;  %s1503_s17 = sphi %s1542_s17, %s14_s17   ;;  %s1499_s16 = sphi %s1540_s16, %s2324_s16   ;;  %s1495_s15 = sphi %s1538_s15, %s2323_s15  }
   0x3   : > { %p28_p1 = scmp.ge.s32.totalorder %s26_s18, 2  ;;  %p196_p2 = scmp.lt.s32.totalorder %s1503_s17, 3 }
   0x5   : > { %s2326_s18 = smov (%p28_p1, %s26_s18), 0  ;;  %p197_p3 = pnand %p1401_p0, %p196_p2 }
   0x6   : > { %p236_p4 = scmp.lt.s32.totalorder (!%p197_p3), %s1495_s15, 1 }
   0x7   : > { %200 = sbr.rel (%p197_p3) target bundleno = 297 (0x129), region = 36 }
   0xc   : > { %v317_v0 = vld [vmem:[%s2311_s3] sm:$0xff]  ;;  %v1505_v2 = vmov 0   ;;  %s2328_s15 = smov (!%p236_p4, %s1495_s15), 1  ;;  %v318_v6 = vld [vmem:[%s2311_s3 + $0x8] sm:$0xff]  ;;  %v1506_v34 = vmov 683565275  }
   0xd   : > { %v315_v1 = vld [vmem:[%s2310_s2] sm:$0xff]  ;;  %1472 = vset.pattern.permute.xlu1 %v1505_v2  ;;  %1471 = vset.pattern.permute.xlu0 %v1505_v2  ;;  %s1564_s23 = sshll.u32 %s2328_s15, 6  ;;  %v316_v7 = vld [vmem:[%s2310_s2 + $0x8] sm:$0xff]  ;;  %v1507_v36 = vmov 2475754826   ;;  %vm270_vm2 = vcmask 64512  }
   0xe   : > { %333 = vperm.xlu1 %1472, %v317_v0   ;;  %321 = vperm.xlu0 %1471, %v315_v1   ;;  %s1570_s26 = scalar_lea.vmem %s2309_s1, %s1564_s23  ;;  %s243_s7 = scalar_lea.vmem %s2308_s0, %s1564_s23  ;;  %v1508_v40 = vmov 2131351028   ;;  %v1509_v42 = vmov 2102212464   ;;  %v1510_v44 = vmov 920167782  }
   0xf   : > { %v1573_v3 = vld [vmem:[%s1570_s26] sm:$0xff]  ;;  %v1576_v4 = vld [vmem:[%s1570_s26 + $0x8] sm:$0xff]  ;;  %v1408_v5 = vld [vmem:[%s1570_s26 + $0x10] sm:$0xff]  ;;  %v1511_v51 = vmov 16.0   ;;  %v1512_v59 = vmov 1326507024   ;;  %s1899_s10 = scalar_lea.vmem %s2312_s4, %s1564_s23 }
  0x10   : > { %v1409_v8 = vld [vmem:[%s1570_s26 + $0x18] sm:$0xff]  ;;  %v1587_v9 = vsub.f32 %v1573_v3, %v1408_v5  ;;  %v260_v13 = vld [vmem:[%s243_s7] sm:$0xff]  ;;  %v261_v14 = vld [vmem:[%s243_s7 + $0x8] sm:$0xff] }
  0x11   : > { %v1594_v10 = vsub.f32 %v1576_v4, %v1409_v8  ;;  %v262_v16 = vmul.f32 %v260_v13, %v260_v13  ;;  %v263_v17 = vmul.f32 %v261_v14, %v261_v14 }
  0x12   : > { %v355_v11 = vand.u32 2139095040, %v1587_v9  ;;  %v352_v22 = vand.u32 2147483647, %v1587_v9 }
  0x13   : > { %v509_v12 = vand.u32 2139095040, %v1594_v10  ;;  %v264_v20 = vadd.f32 1e-08, %v262_v16  ;;  %v265_v21 = vadd.f32 1e-08, %v263_v17 }
  0x14   : > { %v356_v15 = vshrl.u32 %v355_v11, 23  ;;  %v359_v24 = vand.u32 8388607, %v352_v22  ;;  %v506_v28 = vand.u32 2147483647, %v1594_v10 }
  0x15   : > { %v510_v18 = vshrl.u32 %v509_v12, 23  ;;  %1473 = vlog2.f32 %v264_v20 }
  0x16   : > { %338 = vperm.xlu1 %1472, %v318_v6   ;;  %326 = vperm.xlu0 %1471, %v316_v7   ;;  %v1410_v19 = vadd.s32 4294967169, %v356_v15  ;;  %1475 = vlog2.f32 %v265_v21  ;;  %v360_v26 = vor.u32 8388608, %v359_v24  ;;  %v1612_v38 = vand.u32 8388607, %v506_v28 }
  0x17   : > { %v1413_v25 = vadd.s32 4294967169, %v510_v18  ;;  %1477 = vrcp.f32 %v1511_v51 }
  0x18   : > { %v362_v23 = vadd.s32 1, %v1410_v19  ;;  %v1604_v31 = vshll.u32 %v360_v26, 8  ;;  %v514_v24 = vor.u32 8388608, %v1612_v38 }
  0x19   : > { %v516_v32 = vadd.s32 1, %v1413_v25 }
  0x1a   : > { %vm363_vm0 = vcmp.gt.s32.totalorder %v362_v23, 0  ;;  %v401_v7 = vand.u32 65535, %v1604_v31  ;;  %v402_v14 = vshrl.u32 %v1604_v31, 16 }
  0x1b   : > { %v364_v27 = vsel %vm363_vm0, %v362_v23, 0  ;;  %v1474_v39 = vpop.eup %1473  ;;  %vm517_vm3 = vcmp.gt.s32.totalorder %v516_v32, 0 }
  0x1c   : > { %v1602_v29 = vshrl.u32 %v364_v27, 5  ;;  %v366_v30 = vand.u32 31, %v364_v27  ;;  %v1476_v46 = vpop.eup %1475  ;;  %v1618_v47 = vmul.f32 0.6931472, %v1474_v39  ;;  %v518_v8 = vsel %vm517_vm3, %v516_v32, 0 }
  0x1d   : > { %v1624_v50 = vmul.f32 0.6931472, %v1476_v46  ;;  %v1478_v11 = vpop.eup %1477  ;;  %v1651_v15 = vand.u32 31, %v518_v8 }
  0x1e   : > { %v1606_v33 = vsub.s32 32, %v366_v30  ;;  %v369_v35 = vshll.u32 %v1506_v34, %v366_v30  ;;  %v372_v37 = vshll.u32 %v1507_v36, %v366_v30  ;;  %v375_v41 = vshll.u32 %v1508_v40, %v366_v30 }
  0x1f   : > { %v378_v43 = vshll.u32 %v1509_v42, %v366_v30  ;;  %v381_v45 = vshll.u32 %v1510_v44, %v366_v30  ;;  %vm384_vm1 = vcmp.lt.s32.totalorder %v1602_v29, 1  ;;  %v271_v53 = vsel %vm270_vm2, %v1618_v47, 0.0 }
  0x20   : > { %v370_v48 = vshrl.u32 %v1507_v36, %v1606_v33  ;;  %v373_v49 = vshrl.u32 %v1508_v40, %v1606_v33  ;;  %v376_v52 = vshrl.u32 %v1509_v42, %v1606_v33  ;;  %v379_v56 = vshrl.u32 %v1510_v44, %v1606_v33 }
  0x21   : > { %v272_v57 = vsel %vm270_vm2, %v1624_v50, 0.0  ;;  %v382_v60 = vshrl.u32 %v1512_v59, %v1606_v33  ;;  %vm386_vm4 = vcmp.lt.s32.totalorder %v1602_v29, 3  ;;  %vm387_vm5 = vcmp.lt.s32.totalorder %v1602_v29, 4 }
  0x22   : > { %v371_v54 = vor.u32 %v370_v48, %v369_v35  ;;  %v374_v55 = vor.u32 %v373_v49, %v372_v37  ;;  %v377_v58 = vor.u32 %v376_v52, %v375_v41  ;;  %v273_v61 = vadd.f32 %v272_v57, %v271_v53 }
  0x23   : > { %v380_v62 = vor.u32 %v379_v56, %v378_v43  ;;  %v383_v63 = vor.u32 %v382_v60, %v381_v45  ;;  %vm385_vm6 = vcmp.lt.s32.totalorder %v1602_v29, 2  ;;  %v281_v17 = vmul.f32 16.0, %v1478_v11 }
  0x24   : > { %v392_v0 = vsel %vm384_vm1, %v371_v54, %v374_v55  ;;  %v396_v1 = vsel %vm384_vm1, %v374_v55, %v377_v58  ;;  %v274_v5 = vrot.slane %v273_v61, 4  ;;  %v1660_v37 = vshrl.u32 %v518_v8, 5 }
  0x25   : > { %v393_v6 = vsel %vm387_vm5, %v380_v62, 920167782  ;;  %v397_v13 = vsel %vm387_vm5, %v383_v63, 1326507024  ;;  %v282_v26 = vsub.f32 1.0, %v281_v17  ;;  %v1663_v39 = vsub.s32 32, %v1651_v15 }
  0x26   : > { %v394_v12 = vsel %vm386_vm4, %v377_v58, %v393_v6  ;;  %v275_v16 = vadd.f32 %v274_v5, %v273_v61  ;;  %v398_v19 = vsel %vm386_vm4, %v380_v62, %v397_v13  ;;  %v368_v45 = vshrl.u32 %v1506_v34, %v1606_v33 }
  0x27   : > { %v395_v18 = vsel %vm385_vm6, %v392_v0, %v394_v12  ;;  %v399_v20 = vsel %vm385_vm6, %v396_v1, %v398_v19  ;;  %v283_v43 = vmul.f32 %v1478_v11, %v282_v26  ;;  %v389_v48 = vsel %vm387_vm5, %v377_v58, 2102212464 }
  0x28   : > { %v425_v21 = vand.u32 65535, %v395_v18  ;;  %v426_v23 = vshrl.u32 %v395_v18, 16  ;;  %v276_v25 = vrot.slane %v275_v16, 2  ;;  %v403_v27 = vand.u32 65535, %v399_v20 }
  0x29   : > { %v404_v30 = vshrl.u32 %v399_v20, 16  ;;  %v284_v56 = vadd.f32 %v1478_v11, %v283_v43  ;;  %v388_v57 = vsel %vm384_vm1, %v368_v45, %v371_v54  ;;  %v390_v60 = vsel %vm386_vm4, %v374_v55, %v389_v48 }
  0x2a   : > { %v427_v32 = vmul.u32 %v425_v21, %v401_v7  ;;  %v428_v35 = vmul.u32 %v426_v23, %v401_v7  ;;  %v277_v41 = vadd.f32 %v276_v25, %v275_v16  ;;  %v429_v46 = vmul.u32 %v425_v21, %v402_v14 }
  0x2b   : > { %v405_v49 = vmul.u32 %v403_v27, %v401_v7  ;;  %v406_v51 = vmul.u32 %v404_v30, %v401_v7  ;;  %v407_v52 = vmul.u32 %v403_v27, %v402_v14  ;;  %vm285_vm7 = vweird.f32 %v1478_v11 }
  0x2c   : > { %v278_v53 = vrot.slane %v277_v41, 1  ;;  %v408_v61 = vmul.u32 %v404_v30, %v402_v14  ;;  %v430_v63 = vmul.u32 %v426_v23, %v402_v14  ;;  %v1673_v0 = vsel %vm285_vm7, %v1478_v11, %v284_v56 }
  0x2d   : > { %v409_v62 = vshll.u32 %v406_v51, 16  ;;  %v391_v58 = vsel %vm385_vm6, %v388_v57, %v390_v60  ;;  %v411_v1 = vshll.u32 %v407_v52, 16  ;;  %v410_v5 = vshrl.u32 %v406_v51, 16 }
  0x2e   : > { %v279_v33 = vadd.f32 %v278_v53, %v277_v41  ;;  %v431_v7 = vshll.u32 %v428_v35, 16  ;;  %v412_v8 = vshrl.u32 %v407_v52, 16  ;;  %v433_v12 = vshll.u32 %v429_v46, 16 }
  0x2f   : > { %vm413_vm8 = vc.u32 %v405_v49, %v409_v62  ;;  %v415_v6 = vadd.s32 %v409_v62, %v405_v49  ;;  %v432_v19 = vshrl.u32 %v428_v35, 16  ;;  %v434_v25 = vshrl.u32 %v429_v46, 16 }
  0x30   : > { %v287_v54 = vmul.f32 %v1673_v0, %v279_v33  ;;  %v414_v55 = vsel %vm413_vm8, 1, %v1505_v2  ;;  %vm435_vm10 = vc.u32 %v427_v32, %v431_v7  ;;  %v437_v14 = vadd.s32 %v431_v7, %v427_v32 }
  0x31   : > { %v416_v13 = vadd.s32 %v414_v55, %v408_v61  ;;  %vm417_vm9 = vc.u32 %v415_v6, %v411_v1  ;;  %v436_v17 = vsel %vm435_vm10, 1, %v1505_v2  ;;  %v523_v30 = vshll.u32 %v1506_v34, %v1651_v15 }
  0x32   : > { %v1680_v11 = vsub.f32 %v1618_v47, %v287_v54  ;;  %v1683_v29 = vsub.f32 %v1624_v50, %v287_v54  ;;  %v418_v16 = vsel %vm417_vm9, 1, %v1505_v2  ;;  %v438_v20 = vadd.s32 %v436_v17, %v430_v63 }
  0x33   : > { %v420_v18 = vadd.s32 %v418_v16, %v416_v13  ;;  %vm439_vm11 = vc.u32 %v437_v14, %v433_v12  ;;  %v1692_v50 = vadd.s32 %v437_v14, %v433_v12  ;;  %v524_v41 = vshrl.u32 %v1507_v36, %v1663_v39 }
  0x34   : > { %v290_v21 = vmul.f32 %v1680_v11, %v1680_v11  ;;  %v291_v23 = vmul.f32 %v1683_v29, %v1683_v29  ;;  %v440_v47 = vsel %vm439_vm11, 1, %v1505_v2  ;;  %v526_v43 = vshll.u32 %v1507_v36, %v1651_v15 }
  0x35   : > { %v421_v26 = vadd.s32 %v420_v18, %v410_v5  ;;  %v442_v27 = vadd.s32 %v440_v47, %v438_v20  ;;  %v527_v49 = vshrl.u32 %v1508_v40, %v1663_v39  ;;  %v445_v51 = vmul.u32 %v1604_v31, %v391_v58 }
  0x36   : > { %v292_v32 = vsel %vm270_vm2, %v290_v21, 0.0  ;;  %v293_v35 = vsel %vm270_vm2, %v291_v23, 0.0  ;;  %v529_v52 = vshll.u32 %v1508_v40, %v1651_v15  ;;  %v530_v53 = vshrl.u32 %v1509_v42, %v1663_v39 }
  0x37   : > { %v294_v45 = vadd.f32 %v293_v35, %v292_v32  ;;  %v1702_v46 = vadd.s32 %v421_v26, %v412_v8  ;;  %v443_v48 = vadd.s32 %v442_v27, %v432_v19  ;;  %v532_v56 = vshll.u32 %v1509_v42, %v1651_v15  ;;  %v1416_v26 = vld [vmem:[%s1570_s26 + $0x20] sm:$0xff] }
  0x38   : > { %v525_v61 = vor.u32 %v524_v41, %v523_v30  ;;  %v528_v62 = vor.u32 %v527_v49, %v526_v43  ;;  %v533_v63 = vshrl.u32 %v1510_v44, %v1663_v39  ;;  %v535_v31 = vshll.u32 %v1510_v44, %v1651_v15 }
  0x39   : > { %v295_v57 = vrot.slane %v294_v45, 4  ;;  %v444_v60 = vadd.s32 %v443_v48, %v434_v25  ;;  %vm447_vm12 = vc.u32 %v1702_v46, %v1692_v50  ;;  %v536_v33 = vshrl.u32 %v1512_v59, %v1663_v39 }
  0x3a   : > { %v531_v5 = vor.u32 %v530_v53, %v529_v52  ;;  %vm538_vm13 = vcmp.lt.s32.totalorder %v1660_v37, 1  ;;  %v534_v6 = vor.u32 %v533_v63, %v532_v56  ;;  %vm540_vm14 = vcmp.lt.s32.totalorder %v1660_v37, 3 }
  0x3b   : > { %v296_v58 = vadd.f32 %v295_v57, %v294_v45  ;;  %v448_v1 = vadd.s32 1, %v444_v60  ;;  %v537_v7 = vor.u32 %v536_v33, %v535_v31  ;;  %vm541_vm15 = vcmp.lt.s32.totalorder %v1660_v37, 4 }
  0x3c   : > { %vm539_vm0 = vcmp.lt.s32.totalorder %v1660_v37, 2  ;;  %v546_v55 = vsel %vm538_vm13, %v525_v61, %v528_v62  ;;  %v547_v12 = vsel %vm541_vm15, %v534_v6, 920167782  ;;  %v522_v14 = vshrl.u32 %v1506_v34, %v1663_v39 }
  0x3d   : > { %v297_v54 = vrot.slane %v296_v58, 2  ;;  %v449_v8 = vsel %vm447_vm12, %v448_v1, %v444_v60  ;;  %v548_v16 = vsel %vm540_vm14, %v531_v5, %v547_v12  ;;  %v550_v17 = vsel %vm538_vm13, %v528_v62, %v531_v5 }
  0x3e   : > { %v450_v15 = vadd.s32 %v449_v8, %v445_v51  ;;  %v549_v19 = vsel %vm539_vm0, %v546_v55, %v548_v16  ;;  %v551_v20 = vsel %vm541_vm15, %v537_v7, 1326507024  ;;  %v1741_v21 = vshll.u32 %v514_v24, 8 }
  0x3f   : > { %v298_v13 = vadd.f32 %v297_v54, %v296_v58  ;;  %v552_v39 = vsel %vm540_vm14, %v534_v6, %v551_v20  ;;  %v579_v25 = vand.u32 65535, %v549_v19  ;;  %v580_v47 = vshrl.u32 %v549_v19, 16 }
  0x40   : > { %v451_v18 = vadd.s32 536870912, %v450_v15  ;;  %v553_v30 = vsel %vm539_vm0, %v550_v17, %v552_v39  ;;  %v555_v32 = vand.u32 65535, %v1741_v21  ;;  %v556_v35 = vshrl.u32 %v1741_v21, 16 }
  0x41   : > { %v299_v23 = vrot.slane %v298_v13, 1  ;;  %v557_v38 = vand.u32 65535, %v553_v30  ;;  %v558_v24 = vshrl.u32 %v553_v30, 16  ;;  %v542_v45 = vsel %vm538_vm13, %v522_v14, %v525_v61 }
  0x42   : > { %v1746_v27 = vshrl.u32 %v451_v18, 30  ;;  %v1755_v48 = vmul.u32 %v580_v47, %v555_v32  ;;  %v1758_v49 = vsub.f32 %v1573_v3, %v1416_v26  ;;  %v543_v52 = vsel %vm541_vm15, %v531_v5, 2102212464 }
  0x43   : > { %v300_v41 = vadd.f32 %v299_v23, %v298_v13  ;;  %v559_v53 = vmul.u32 %v557_v38, %v555_v32  ;;  %v560_v56 = vmul.u32 %v558_v24, %v555_v32  ;;  %v561_v60 = vmul.u32 %v557_v38, %v556_v35 }
  0x44   : > { %v453_v43 = vshll.u32 %v1746_v27, 30  ;;  %v581_v63 = vmul.u32 %v579_v25, %v555_v32  ;;  %v1763_v31 = vmul.u32 %v579_v25, %v556_v35  ;;  %v562_v61 = vmul.u32 %v558_v24, %v556_v35 }
  0x45   : > { %v301_v51 = vmul.f32 %v300_v41, %v1673_v0  ;;  %v563_v58 = vshll.u32 %v560_v56, 16  ;;  %v585_v1 = vshll.u32 %v1755_v48, 16  ;;  %v544_v0 = vsel %vm540_vm14, %v528_v62, %v543_v52 }
  0x46   : > { %v454_v57 = vsub.s32 %v450_v15, %v453_v43  ;;  %v565_v6 = vshll.u32 %v561_v60, 16  ;;  %v584_v7 = vmul.u32 %v580_v47, %v556_v35  ;;  %v564_v8 = vshrl.u32 %v560_v56, 16 }
  0x47   : > { %v1765_v33 = vadd.f32 1e-05, %v301_v51  ;;  %vm567_vm3 = vc.u32 %v559_v53, %v563_v58  ;;  %v569_v5 = vadd.s32 %v563_v58, %v559_v53  ;;  %v587_v55 = vshll.u32 %v1763_v31, 16  ;;  %v1417_v51 = vld [vmem:[%s1570_s26 + $0x28] sm:$0xff] }
  0x48   : > { %vm455_vm1 = vcmp.lt.s32.totalorder %v454_v57, 0  ;;  %v456_v3 = vsub.s32 0, %v454_v57  ;;  %v568_v15 = vsel %vm567_vm3, 1, %v1505_v2  ;;  %vm589_vm5 = vc.u32 %v581_v63, %v585_v1 }
  0x49   : > { %1479 = vrsqrt.f32 %v1765_v33  ;;  %v570_v13 = vadd.s32 %v568_v15, %v562_v61  ;;  %vm571_vm4 = vc.u32 %v569_v5, %v565_v6  ;;  %v545_v14 = vsel %vm539_vm0, %v542_v45, %v544_v0 }
  0x4a   : > { %v457_v54 = vsel %vm455_vm1, %v456_v3, %v454_v57  ;;  %v572_v62 = vsel %vm571_vm4, 1, %v1505_v2  ;;  %v590_v16 = vsel %vm589_vm5, 1, %v1505_v2  ;;  %v591_v17 = vadd.s32 %v585_v1, %v581_v63 }
  0x4b   : > { %v458_v12 = vclz %v457_v54  ;;  %v446_v18 = vadd.s32 %v1692_v50, %v1702_v46  ;;  %v574_v20 = vadd.s32 %v572_v62, %v570_v13  ;;  %v672_v23 = vand.u32 2139095040, %v1758_v49 }
  0x4c   : > { %v566_v39 = vshrl.u32 %v561_v60, 16  ;;  %v592_v25 = vadd.s32 %v590_v16, %v584_v7  ;;  %vm593_vm6 = vc.u32 %v591_v17, %v587_v55  ;;  %v669_v47 = vand.u32 2147483647, %v1758_v49 }
  0x4d   : > { %v1411_v19 = vadd.s32 4294967294, %v458_v12  ;;  %v575_v26 = vadd.s32 %v574_v20, %v564_v8  ;;  %v594_v30 = vsel %vm593_vm6, 1, %v1505_v2  ;;  %v673_v32 = vshrl.u32 %v672_v23, 23 }
  0x4e   : > { %v586_v50 = vshrl.u32 %v1755_v48, 16  ;;  %v588_v46 = vshrl.u32 %v1763_v31, 16  ;;  %v595_v45 = vadd.s32 %v591_v17, %v587_v55  ;;  %v596_v56 = vadd.s32 %v594_v30, %v592_v25 }
  0x4f   : > { %v1480_v37 = vpop.eup %1479  ;;  %vm1412_vm7 = vcmp.lt.s32.totalorder %v1411_v19, 0  ;;  %v576_v53 = vadd.s32 %v575_v26, %v566_v39  ;;  %v676_v60 = vand.u32 8388607, %v669_v47  ;;  %v1418_v58 = vadd.s32 4294967169, %v673_v32 }
  0x50   : > { %v304_v35 = vmul.f32 %v1480_v37, %v1765_v33  ;;  %v461_v41 = vsel %vm1412_vm7, 0, %v1411_v19  ;;  %v597_v3 = vadd.s32 %v596_v56, %v586_v50  ;;  %v1789_v48 = vsub.f32 %v1576_v4, %v1417_v51 }
  0x51   : > { %v462_v38 = vsub.s32 32, %v461_v41  ;;  %v463_v24 = vshll.u32 %v454_v57, %v461_v41  ;;  %v466_v43 = vsub.s32 4294967266, %v461_v41  ;;  %v599_v57 = vmul.u32 %v1741_v21, %v545_v14 }
  0x52   : > { %v305_v52 = vmul.f32 %v1480_v37, %v304_v35  ;;  %v679_v6 = vadd.s32 1, %v1418_v58  ;;  %v598_v7 = vadd.s32 %v597_v3, %v588_v46  ;;  %vm601_vm8 = vc.u32 %v576_v53, %v595_v45 }
  0x53   : > { %v464_v63 = vshrl.u32 %v446_v18, %v462_v38  ;;  %v467_v61 = vadd.s32 127, %v466_v43  ;;  %v677_v54 = vor.u32 8388608, %v676_v60  ;;  %vm309_vm9 = vweird.f32 %v1765_v33 }
  0x54   : > { %v306_v1 = vmul.f32 0.5, %v305_v52  ;;  %vm310_vm10 = vweird.f32 %v1480_v37  ;;  %v602_v12 = vadd.s32 1, %v598_v7  ;;  %vm680_vm11 = vcmp.gt.s32.totalorder %v679_v6, 0 }
  0x55   : > { %v465_v31 = vor.u32 %v464_v63, %v463_v24  ;;  %v468_v0 = vshll.u32 %v467_v61, 23  ;;  %vm311_vm12 = vmor %vm309_vm9, %vm310_vm10  ;;  %v681_v13 = vsel %vm680_vm11, %v679_v6, 0  ;;  %v1793_v17 = vshll.u32 %v677_v54, 8 }
  0x56   : > { %v307_v5 = vsub.f32 1.5, %v306_v1  ;;  %v603_v62 = vsel %vm601_vm8, %v602_v12, %v598_v7  ;;  %v683_v16 = vand.u32 31, %v681_v13  ;;  %v826_v21 = vand.u32 2139095040, %v1789_v48 }
  0x57   : > { %v469_v8 = vor.u32 4788187, %v468_v0  ;;  %v472_v15 = vcvt.s32.f32 %v465_v31  ;;  %v604_v18 = vadd.s32 %v603_v62, %v599_v57  ;;  %vm1798_vm13 = vcmp.le.f32.partialorder %v352_v22, 0.7853982 }
  0x58   : > { %v308_v55 = vmul.f32 %v1480_v37, %v307_v5  ;;  %vm354_vm14 = vcmp.lt.s32.totalorder %v1587_v9, 0  ;;  %v823_v20 = vand.u32 2147483647, %v1789_v48  ;;  %v1804_v39 = vadd.s32 %v595_v45, %v576_v53 }
  0x59   : > { %v470_v4 = vand.u32 2147483647, %v469_v8  ;;  %v605_v25 = vadd.s32 536870912, %v604_v18  ;;  %v684_v26 = vsub.s32 32, %v683_v16  ;;  %v476_v30 = vsub.s32 4, %v1746_v27 }
  0x5a   : > { %v312_v19 = vsel %vm311_vm12, %v1480_v37, %v308_v55  ;;  %v1808_v32 = vand.u32 65535, %v1793_v17  ;;  %v1811_v37 = vshrl.u32 %v1793_v17, 16  ;;  %v827_v22 = vshrl.u32 %v826_v21, 23 }
  0x5b   : > { %v473_v14 = vmul.f32 %v472_v15, %v470_v4  ;;  %v1814_v35 = vmul.f32 %v312_v19, %v1680_v11  ;;  %v1816_v50 = vshrl.u32 %v605_v25, 30  ;;  %v1818_v46 = vshrl.u32 %v681_v13, 5 }
  0x5c   : > { %v477_v38 = vsel %vm354_vm14, %v476_v30, %v1746_v27  ;;  %v686_v43 = vshll.u32 %v1506_v34, %v683_v16  ;;  %v689_v45 = vshll.u32 %v1507_v36, %v683_v16  ;;  %v687_v11 = vshrl.u32 %v1507_v36, %v684_v26 }
  0x5d   : > { %v474_v23 = vxor.u32 2147483648, %v473_v14  ;;  %v607_v52 = vshll.u32 %v1816_v50, 30  ;;  %v692_v53 = vshll.u32 %v1508_v40, %v683_v16  ;;  %v690_v56 = vshrl.u32 %v1508_v40, %v684_v26 }
  0x5e   : > { %v693_v60 = vshrl.u32 %v1509_v42, %v684_v26  ;;  %v695_v27 = vshll.u32 %v1509_v42, %v683_v16  ;;  %v696_v63 = vshrl.u32 %v1510_v44, %v684_v26  ;;  %v479_v61 = vsel %vm1798_vm13, 0, %v477_v38 }
  0x5f   : > { %v475_v41 = vsel %vm354_vm14, %v474_v23, %v473_v14  ;;  %v1835_v3 = vsub.s32 %v604_v18, %v607_v52  ;;  %v685_v31 = vshrl.u32 %v1506_v34, %v684_v26  ;;  %v698_v0 = vshll.u32 %v1510_v44, %v683_v16 }
  0x60   : > { %v478_v24 = vsel %vm1798_vm13, %v1587_v9, %v475_v41  ;;  %v699_v57 = vshrl.u32 %v1512_v59, %v684_v26  ;;  %v1840_v6 = vadd.s32 4294967169, %v827_v22  ;;  %v688_v54 = vor.u32 %v687_v11, %v686_v43 }
  0x61   : > { %v480_v51 = vmul.f32 %v478_v24, %v478_v24  ;;  %vm609_vm15 = vcmp.lt.s32.totalorder %v1835_v3, 0  ;;  %v496_v8 = vand.u32 3, %v479_v61  ;;  %v610_v15 = vsub.s32 0, %v1835_v3 }
  0x62   : > { %v691_v55 = vor.u32 %v690_v56, %v689_v45  ;;  %v697_v12 = vor.u32 %v696_v63, %v695_v27  ;;  %v694_v62 = vor.u32 %v693_v60, %v692_v53  ;;  %vm704_vm0 = vcmp.lt.s32.totalorder %v1818_v46, 4 }
  0x63   : > { %v481_v58 = vmul.f32 -0.001358992, %v480_v51  ;;  %v488_v1 = vmul.f32 -0.00019511016, %v480_v51  ;;  %v1846_v16 = vmul.f32 %v312_v19, %v1683_v29  ;;  %v611_v21 = vsel %vm609_vm15, %v610_v15, %v1835_v3 }
  0x64   : > { %v700_v14 = vor.u32 %v699_v57, %v698_v0  ;;  %vm701_vm1 = vcmp.lt.s32.totalorder %v1818_v46, 1  ;;  %vm508_vm3 = vcmp.lt.s32.totalorder %v1594_v10, 0  ;;  %v612_v23 = vclz %v611_v21 }
  0x65   : > { %v482_v5 = vadd.f32 0.041655596, %v481_v58  ;;  %v489_v7 = vadd.f32 0.008332121, %v488_v1  ;;  %vm703_vm4 = vcmp.lt.s32.totalorder %v1818_v46, 3  ;;  %vm498_vm5 = vcmp.eq.s32.totalorder %v496_v8, 0 }
  0x66   : > { %vm501_vm6 = vcmp.eq.s32.totalorder %v496_v8, 2  ;;  %vm702_vm7 = vcmp.lt.s32.totalorder %v1818_v46, 2  ;;  %v710_v29 = vsel %vm704_vm0, %v697_v12, 920167782  ;;  %vm497_vm8 = vcmp.lt.s32.totalorder %v496_v8, 2 }
  0x67   : > { %v483_v4 = vmul.f32 %v482_v5, %v480_v51  ;;  %v490_v13 = vmul.f32 %v489_v7, %v480_v51  ;;  %v1414_v26 = vadd.s32 4294967294, %v612_v23  ;;  %vm495_vm9 = vweird.f32 %v1587_v9 }
  0x68   : > { %vm1858_vm10 = vcmp.le.f32.partialorder %v506_v28, 0.7853982  ;;  %v709_v22 = vsel %vm701_vm1, %v688_v54, %v691_v55  ;;  %v711_v41 = vsel %vm703_vm4, %v694_v62, %v710_v29  ;;  %v714_v38 = vsel %vm704_vm0, %v700_v14, 1326507024 }
  0x69   : > { %v484_v18 = vadd.f32 -0.4999988, %v483_v4  ;;  %v491_v33 = vadd.f32 -0.16666654, %v490_v13  ;;  %vm1415_vm11 = vcmp.lt.s32.totalorder %v1414_v26, 0  ;;  %v630_v28 = vsub.s32 4, %v1816_v50 }
  0x6a   : > { %v615_v52 = vsel %vm1415_vm11, 0, %v1414_v26  ;;  %v706_v11 = vsel %vm704_vm0, %v694_v62, 2102212464  ;;  %v715_v53 = vsel %vm703_vm4, %v697_v12, %v714_v38  ;;  %v705_v58 = vsel %vm701_vm1, %v685_v31, %v688_v54 }
  0x6b   : > { %v485_v19 = vmul.f32 %v484_v18, %v480_v51  ;;  %v492_v25 = vmul.f32 %v491_v33, %v480_v51  ;;  %v713_v51 = vsel %vm701_vm1, %v691_v55, %v694_v62  ;;  %v616_v27 = vsub.s32 32, %v615_v52 }
  0x6c   : > { %v617_v63 = vshll.u32 %v1835_v3, %v615_v52  ;;  %v620_v61 = vsub.s32 4294967266, %v615_v52  ;;  %v712_v1 = vsel %vm702_vm7, %v709_v22, %v711_v41  ;;  %v716_v0 = vsel %vm702_vm7, %v713_v51, %v715_v53 }
  0x6d   : > { %v486_v43 = vadd.f32 1.0, %v485_v19  ;;  %v493_v45 = vadd.f32 1.0, %v492_v25  ;;  %v707_v7 = vsel %vm703_vm4, %v691_v55, %v706_v11  ;;  %v1889_v31 = vsel %vm508_vm3, %v630_v28, %v1816_v50 }
  0x6e   : > { %v621_v3 = vadd.s32 127, %v620_v61  ;;  %v720_v54 = vand.u32 65535, %v716_v0  ;;  %v721_v15 = vshrl.u32 %v716_v0, 16  ;;  %v742_v13 = vand.u32 65535, %v712_v1 }
  0x6f   : > { %v494_v56 = vmul.f32 %v493_v45, %v478_v24  ;;  %v502_v60 = vxor.u32 2147483648, %v486_v43  ;;  %v618_v24 = vshrl.u32 %v1804_v39, %v616_v27  ;;  %v743_v62 = vshrl.u32 %v712_v1, 16 }
  0x70   : > { %v622_v14 = vshll.u32 %v621_v3, 23  ;;  %v722_v39 = vmul.u32 %v720_v54, %v1808_v32  ;;  %v723_v55 = vmul.u32 %v721_v15, %v1808_v32  ;;  %v633_v18 = vsel %vm1858_vm10, 0, %v1889_v31 }
  0x71   : > { %v499_v57 = vxor.u32 2147483648, %v494_v56  ;;  %v503_v5 = vsel %vm501_vm6, %v502_v60, %v494_v56  ;;  %v619_v4 = vor.u32 %v618_v24, %v617_v63  ;;  %v1908_v8 = vsel %vm702_vm7, %v705_v58, %v707_v7 }
  0x72   : > { %v724_v33 = vmul.u32 %v720_v54, %v1811_v37  ;;  %v623_v23 = vor.u32 4788187, %v622_v14  ;;  %v725_v19 = vmul.u32 %v721_v15, %v1811_v37  ;;  %v726_v25 = vshll.u32 %v723_v55, 16 }
  0x73   : > { %v500_v12 = vsel %vm498_vm5, %v486_v43, %v499_v57  ;;  %v626_v29 = vcvt.s32.f32 %v619_v4  ;;  %v744_v26 = vmul.u32 %v742_v13, %v1808_v32  ;;  %v745_v22 = vmul.u32 %v743_v62, %v1808_v32 }
  0x74   : > { %v504_v21 = vsel %vm497_vm8, %v500_v12, %v503_v5  ;;  %v728_v9 = vshll.u32 %v724_v33, 16  ;;  %v746_v41 = vmul.u32 %v742_v13, %v1811_v37  ;;  %v624_v38 = vand.u32 2147483647, %v623_v23 }
  0x75   : > { %v505_v50 = vsel %vm495_vm9, nan, %v504_v21  ;;  %v727_v46 = vshrl.u32 %v723_v55, 16  ;;  %vm730_vm12 = vc.u32 %v722_v39, %v726_v25  ;;  %v732_v43 = vadd.s32 %v726_v25, %v722_v39 }
  0x76   : > { %660 = vst.msk [vmem:[%s1899_s10 + $0x10] sm:$0xff] %vm270_vm2, %v505_v50  ;;  %v731_v45 = vsel %vm730_vm12, 1, %v1505_v2  ;;  %v747_v51 = vmul.u32 %v743_v62, %v1811_v37  ;;  %v748_v52 = vshll.u32 %v745_v22, 16  ;;  %v750_v28 = vshll.u32 %v746_v41, 16 }
  0x77   : > { %v627_v11 = vmul.f32 %v626_v29, %v624_v38  ;;  %v729_v53 = vshrl.u32 %v724_v33, 16  ;;  %v733_v56 = vadd.s32 %v731_v45, %v725_v19  ;;  %vm734_vm13 = vc.u32 %v732_v43, %v728_v9 }
  0x78   : > { %v735_v32 = vsel %vm734_vm13, 1, %v1505_v2  ;;  %vm752_vm14 = vc.u32 %v744_v26, %v748_v52  ;;  %v754_v63 = vadd.s32 %v748_v52, %v744_v26  ;;  %v833_v61 = vadd.s32 1, %v1840_v6 }
  0x79   : > { %v628_v1 = vxor.u32 2147483648, %v627_v11  ;;  %v737_v0 = vadd.s32 %v735_v32, %v733_v56  ;;  %v753_v37 = vsel %vm752_vm14, 1, %v1505_v2  ;;  %v749_v57 = vshrl.u32 %v745_v22, 16 }
  0x7a   : > { %v755_v5 = vadd.s32 %v753_v37, %v747_v51  ;;  %vm756_vm15 = vc.u32 %v754_v63, %v750_v28  ;;  %vm834_vm0 = vcmp.gt.s32.totalorder %v833_v61, 0  ;;  %v751_v6 = vshrl.u32 %v746_v41, 16 }
  0x7b   : > { %v629_v7 = vsel %vm508_vm3, %v628_v1, %v627_v11  ;;  %v738_v3 = vadd.s32 %v737_v0, %v727_v46  ;;  %v757_v31 = vsel %vm756_vm15, 1, %v1505_v2  ;;  %v835_v15 = vsel %vm834_vm0, %v833_v61, 0 }
  0x7c   : > { %v759_v54 = vadd.s32 %v757_v31, %v755_v5  ;;  %v1933_v13 = vadd.s32 %v754_v63, %v750_v28  ;;  %v837_v62 = vand.u32 31, %v835_v15  ;;  %v762_v55 = vmul.u32 %v1793_v17, %v1908_v8 }
  0x7d   : > { %v1931_v4 = vadd.s32 %v738_v3, %v729_v53  ;;  %v830_v30 = vand.u32 8388607, %v823_v20  ;;  %v1939_v33 = vand.u32 3, %v633_v18  ;;  %v1941_v29 = vshrl.u32 %v835_v15, 5 }
  0x7e   : > { %v760_v21 = vadd.s32 %v759_v54, %v749_v57  ;;  %v1943_v19 = vsub.s32 32, %v837_v62  ;;  %v840_v22 = vshll.u32 %v1506_v34, %v837_v62  ;;  %v843_v41 = vshll.u32 %v1507_v36, %v837_v62 }
  0x7f   : > { %vm764_vm1 = vc.u32 %v1931_v4, %v1933_v13  ;;  %v849_v28 = vshll.u32 %v1509_v42, %v837_v62  ;;  %vm651_vm3 = vcmp.lt.s32.totalorder %v1939_v33, 2  ;;  %v852_v63 = vshll.u32 %v1510_v44, %v837_v62 }
  0x80   : > { %v334_v60 = vpop.permute.xlu1 %333  ;;  %v322_v27 = vpop.permute.xlu0 %321  ;;  %v761_v23 = vadd.s32 %v760_v21, %v751_v6  ;;  %v841_v18 = vshrl.u32 %v1507_v36, %v1943_v19  ;;  %v844_v51 = vshrl.u32 %v1508_v40, %v1943_v19  ;;  %v847_v52 = vshrl.u32 %v1509_v42, %v1943_v19 }
  0x81   : > { %v329_v58 = vmul.f32 %v322_v27, %v1814_v35  ;;  %v632_v35 = vsel %vm1858_vm10, %v1594_v10, %v629_v7  ;;  %v850_v32 = vshrl.u32 %v1510_v44, %v1943_v19  ;;  %v853_v0 = vshrl.u32 %v1512_v59, %v1943_v19 }
  0x82   : > { %v634_v12 = vmul.f32 %v632_v35, %v632_v35  ;;  %v765_v8 = vadd.s32 1, %v761_v23  ;;  %v1961_v27 = vor.u32 %v841_v18, %v840_v22  ;;  %v1968_v37 = vor.u32 %v844_v51, %v843_v41 }
  0x83   : > { %v341_v24 = vadd.f32 %v334_v60, %v329_v58  ;;  %v831_v60 = vor.u32 8388608, %v830_v30  ;;  %v851_v5 = vor.u32 %v850_v32, %v849_v28  ;;  %vm855_vm4 = vcmp.lt.s32.totalorder %v1941_v29, 1  ;;  %v1424_v32 = vld [vmem:[%s1570_s26 + $0x10] sm:$0xff] }
  0x84   : > { %v635_v14 = vmul.f32 -0.001358992, %v634_v12  ;;  %v642_v39 = vmul.f32 -0.00019511016, %v634_v12  ;;  %v766_v45 = vsel %vm764_vm1, %v765_v8, %v761_v23  ;;  %v854_v31 = vor.u32 %v853_v0, %v852_v63  ;;  %v1426_v63 = vld [vmem:[%s1570_s26 + $0x30] sm:$0xff] }
  0x85   : > { %343 = vst.msk [vmem:[%s1899_s10] sm:$0xff] %vm270_vm2, %v341_v24  ;;  %v767_v56 = vadd.s32 %v766_v45, %v762_v55  ;;  %vm652_vm5 = vcmp.eq.s32.totalorder %v1939_v33, 0  ;;  %vm655_vm6 = vcmp.eq.s32.totalorder %v1939_v33, 2  ;;  %vm858_vm7 = vcmp.lt.s32.totalorder %v1941_v29, 4 }
  0x86   : > { %v636_v9 = vadd.f32 0.041655596, %v635_v14  ;;  %v643_v26 = vadd.f32 0.008332121, %v642_v39  ;;  %v1978_v6 = vshll.u32 %v831_v60, 8  ;;  %vm857_vm8 = vcmp.lt.s32.totalorder %v1941_v29, 3 }
  0x87   : > { %v768_v1 = vadd.s32 536870912, %v767_v56  ;;  %vm856_vm9 = vcmp.lt.s32.totalorder %v1941_v29, 2  ;;  %v864_v21 = vsel %vm858_vm7, %v851_v5, 920167782  ;;  %v868_v14 = vsel %vm858_vm7, %v854_v31, 1326507024 }
  0x88   : > { %v327_v50 = vpop.permute.xlu0 %326  ;;  %v339_v17 = vpop.permute.xlu1 %338  ;;  %v637_v46 = vmul.f32 %v636_v9, %v634_v12  ;;  %v644_v43 = vmul.f32 %v643_v26, %v634_v12  ;;  %vm649_vm10 = vweird.f32 %v1594_v10  ;;  %v869_v23 = vsel %vm857_vm8, %v851_v5, %v868_v14 }
  0x89   : > { %v330_v25 = vmul.f32 %v327_v50, %v1846_v16  ;;  %v846_v16 = vshll.u32 %v1508_v40, %v837_v62  ;;  %v1973_v3 = vshrl.u32 %v768_v1, 30  ;;  %v863_v62 = vsel %vm855_vm4, %v1961_v27, %v1968_v37 }
  0x8a   : > { %v638_v11 = vadd.f32 -0.4999988, %v637_v46  ;;  %v645_v53 = vadd.f32 -0.16666654, %v644_v43  ;;  %vm671_vm0 = vcmp.lt.s32.totalorder %v1758_v49, 0 }
  0x8b   : > { %v342_v38 = vadd.f32 %v339_v17, %v330_v25  ;;  %v1970_v57 = vor.u32 %v847_v52, %v846_v16  ;;  %v872_v25 = vand.u32 65535, %v1978_v6  ;;  %v873_v17 = vshrl.u32 %v1978_v6, 16 }
  0x8c   : > { %v639_v61 = vmul.f32 %v638_v11, %v634_v12  ;;  %v646_v58 = vmul.f32 %v645_v53, %v634_v12  ;;  %v770_v12 = vshll.u32 %v1973_v3, 30  ;;  %v763_v53 = vadd.s32 %v1933_v13, %v1931_v4 }
  0x8d   : > { %344 = vst.msk [vmem:[%s1899_s10 + $0x8] sm:$0xff] %vm270_vm2, %v342_v38  ;;  %v867_v30 = vsel %vm855_vm4, %v1968_v37, %v1970_v57  ;;  %v865_v50 = vsel %vm857_vm8, %v1970_v57, %v864_v21 }
  0x8e   : > { %v640_v24 = vadd.f32 1.0, %v639_v61  ;;  %v647_v7 = vadd.f32 1.0, %v646_v58  ;;  %v771_v55 = vsub.s32 %v767_v56, %v770_v12  ;;  %v866_v10 = vsel %vm856_vm9, %v863_v62, %v865_v50 }
  0x8f   : > { %v870_v22 = vsel %vm856_vm9, %v867_v30, %v869_v23  ;;  %v896_v16 = vand.u32 65535, %v866_v10  ;;  %v897_v45 = vshrl.u32 %v866_v10, 16  ;;  %v839_v30 = vshrl.u32 %v1506_v34, %v1943_v19 }
  0x90   : > { %v648_v54 = vmul.f32 %v647_v7, %v632_v35  ;;  %v656_v15 = vxor.u32 2147483648, %v640_v24  ;;  %vm772_vm11 = vcmp.lt.s32.totalorder %v771_v55, 0  ;;  %v773_v26 = vsub.s32 0, %v771_v55 }
  0x91   : > { %v874_v38 = vand.u32 65535, %v870_v22  ;;  %v875_v46 = vshrl.u32 %v870_v22, 16  ;;  %v899_v11 = vmul.u32 %v897_v45, %v872_v25  ;;  %v898_v58 = vmul.u32 %v896_v16, %v872_v25 }
  0x92   : > { %v653_v39 = vxor.u32 2147483648, %v648_v54  ;;  %v657_v35 = vsel %vm655_vm6, %v656_v15, %v648_v54  ;;  %v774_v41 = vsel %vm772_vm11, %v773_v26, %v771_v55  ;;  %v900_v1 = vmul.u32 %v896_v16, %v873_v17 }
  0x93   : > { %v775_v43 = vclz %v774_v41  ;;  %v876_v51 = vmul.u32 %v874_v38, %v872_v25  ;;  %v877_v33 = vmul.u32 %v875_v46, %v872_v25  ;;  %v878_v52 = vmul.u32 %v874_v38, %v873_v17 }
  0x94   : > { %v654_v9 = vsel %vm652_vm5, %v640_v24, %v653_v39  ;;  %v879_v61 = vmul.u32 %v875_v46, %v873_v17  ;;  %v902_v24 = vshll.u32 %v899_v11, 16  ;;  %v2017_v15 = vsub.f32 %v1424_v32, %v1426_v63 }
  0x95   : > { %v658_v8 = vsel %vm651_vm3, %v654_v9, %v657_v35  ;;  %v1419_v28 = vadd.s32 4294967294, %v775_v43  ;;  %v880_v56 = vshll.u32 %v877_v33, 16  ;;  %v882_v60 = vshll.u32 %v878_v52, 16 }
  0x96   : > { %v659_v18 = vsel %vm649_vm10, nan, %v658_v8  ;;  %v881_v12 = vshrl.u32 %v877_v33, 16  ;;  %v901_v13 = vmul.u32 %v897_v45, %v873_v17  ;;  %v793_v35 = vsub.s32 4, %v1973_v3 }
  0x97   : > { %661 = vst.msk [vmem:[%s1899_s10 + $0x18] sm:$0xff] %vm270_vm2, %v659_v18  ;;  %vm1420_vm12 = vcmp.lt.s32.totalorder %v1419_v28, 0  ;;  %vm884_vm13 = vc.u32 %v876_v51, %v880_v56  ;;  %v886_v5 = vadd.s32 %v880_v56, %v876_v51  ;;  %v904_v50 = vshll.u32 %v900_v1, 16 }
  0x98   : > { %v778_v0 = vsel %vm1420_vm12, 0, %v1419_v28  ;;  %v885_v4 = vsel %vm884_vm13, 1, %v1505_v2  ;;  %vm906_vm15 = vc.u32 %v898_v58, %v902_v24  ;;  %v860_v26 = vsel %vm858_vm7, %v1970_v57, 2102212464  ;;  %v1427_v28 = vld [vmem:[%s1570_s26 + $0x38] sm:$0xff] }
  0x99   : > { %v779_v7 = vsub.s32 32, %v778_v0  ;;  %v780_v31 = vshll.u32 %v771_v55, %v778_v0  ;;  %v783_v54 = vsub.s32 4294967266, %v778_v0  ;;  %vm888_vm14 = vc.u32 %v886_v5, %v882_v60 }
  0x9a   : > { %v887_v14 = vadd.s32 %v885_v4, %v879_v61  ;;  %v889_v39 = vsel %vm888_vm14, 1, %v1505_v2  ;;  %v907_v9 = vsel %vm906_vm15, 1, %v1505_v2  ;;  %v908_v17 = vadd.s32 %v902_v24, %v898_v58 }
  0x9b   : > { %v781_v62 = vshrl.u32 %v763_v53, %v779_v7  ;;  %v784_v21 = vadd.s32 127, %v783_v54  ;;  %v909_v8 = vadd.s32 %v907_v9, %v901_v13  ;;  %v989_v10 = vand.u32 2139095040, %v2017_v15 }
  0x9c   : > { %v891_v25 = vadd.s32 %v889_v39, %v887_v14  ;;  %v883_v19 = vshrl.u32 %v878_v52, 16  ;;  %v903_v38 = vshrl.u32 %v899_v11, 16  ;;  %vm910_vm1 = vc.u32 %v908_v17, %v904_v50  ;;  %v1425_v52 = vld [vmem:[%s1570_s26 + $0x18] sm:$0xff] }
  0x9d   : > { %v782_v55 = vor.u32 %v781_v62, %v780_v31  ;;  %v785_v23 = vshll.u32 %v784_v21, 23  ;;  %v990_v46 = vshrl.u32 %v989_v10, 23  ;;  %v859_v57 = vsel %vm855_vm4, %v839_v30, %v1961_v27 }
  0x9e   : > { %v892_v41 = vadd.s32 %v891_v25, %v881_v12  ;;  %v861_v16 = vsel %vm857_vm8, %v1968_v37, %v860_v26  ;;  %v911_v45 = vsel %vm910_vm1, 1, %v1505_v2  ;;  %v905_v51 = vshrl.u32 %v900_v1, 16 }
  0x9f   : > { %v786_v22 = vor.u32 4788187, %v785_v23  ;;  %v789_v18 = vcvt.s32.f32 %v782_v55  ;;  %v913_v33 = vadd.s32 %v911_v45, %v909_v8  ;;  %v986_v53 = vand.u32 2147483647, %v2017_v15 }
  0xa0   : > { %v1428_v11 = vadd.s32 4294967169, %v990_v46  ;;  %v794_v60 = vsel %vm671_vm0, %v793_v35, %v1973_v3  ;;  %v2043_v32 = vadd.s32 %v892_v41, %v883_v19  ;;  %v2045_v27 = vadd.s32 %v908_v17, %v904_v50 }
  0xa1   : > { %v787_v43 = vand.u32 2147483647, %v786_v22  ;;  %v862_v37 = vsel %vm856_vm9, %v859_v57, %v861_v16  ;;  %v914_v63 = vadd.s32 %v913_v33, %v903_v38  ;;  %vm670_vm3 = vcmp.le.f32.partialorder %v669_v47, 0.7853982 }
  0xa2   : > { %v996_v61 = vadd.s32 1, %v1428_v11  ;;  %v2051_v1 = vsub.f32 %v1425_v52, %v1427_v28  ;;  %v796_v0 = vsel %vm670_vm3, 0, %v794_v60  ;;  %v993_v3 = vand.u32 8388607, %v986_v53 }
  0xa3   : > { %v790_v56 = vmul.f32 %v789_v18, %v787_v43  ;;  %v915_v5 = vadd.s32 %v914_v63, %v905_v51  ;;  %v916_v29 = vmul.u32 %v1978_v6, %v862_v37  ;;  %vm918_vm5 = vc.u32 %v2043_v32, %v2045_v27 }
  0xa4   : > { %vm997_vm4 = vcmp.gt.s32.totalorder %v996_v61, 0  ;;  %v2061_v4 = vand.u32 3, %v796_v0  ;;  %v994_v62 = vor.u32 8388608, %v993_v3  ;;  %v1143_v6 = vand.u32 2139095040, %v2051_v1 }
  0xa5   : > { %v791_v58 = vxor.u32 2147483648, %v790_v56  ;;  %v998_v7 = vsel %vm997_vm4, %v996_v61, 0  ;;  %v919_v31 = vadd.s32 1, %v915_v5  ;;  %vm812_vm9 = vweird.f32 %v1758_v49 }
  0xa6   : > { %v1000_v54 = vand.u32 31, %v998_v7  ;;  %vm818_vm6 = vcmp.eq.s32.totalorder %v2061_v4, 2  ;;  %v2074_v8 = vshrl.u32 %v998_v7, 5  ;;  %vm815_vm7 = vcmp.eq.s32.totalorder %v2061_v4, 0 }
  0xa7   : > { %v792_v24 = vsel %vm671_vm0, %v791_v58, %v790_v56  ;;  %v920_v13 = vsel %vm918_vm5, %v919_v31, %v915_v5  ;;  %v1144_v45 = vshrl.u32 %v1143_v6, 23  ;;  %vm814_vm8 = vcmp.lt.s32.totalorder %v2061_v4, 2 }
  0xa8   : > { %v795_v47 = vsel %vm670_vm3, %v1758_v49, %v792_v24  ;;  %v2063_v21 = vsub.s32 32, %v1000_v54  ;;  %v921_v35 = vadd.s32 %v920_v13, %v916_v29  ;;  %v1003_v30 = vshll.u32 %v1506_v34, %v1000_v54 }
  0xa9   : > { %v797_v12 = vmul.f32 %v795_v47, %v795_v47  ;;  %v1006_v55 = vshll.u32 %v1507_v36, %v1000_v54  ;;  %v1012_v17 = vshll.u32 %v1509_v42, %v1000_v54  ;;  %v1009_v10 = vshll.u32 %v1508_v40, %v1000_v54 }
  0xaa   : > { %v1004_v50 = vshrl.u32 %v1507_v36, %v2063_v21  ;;  %v1007_v23 = vshrl.u32 %v1508_v40, %v2063_v21  ;;  %v922_v26 = vadd.s32 536870912, %v921_v35  ;;  %v1010_v22 = vshrl.u32 %v1509_v42, %v2063_v21 }
  0xab   : > { %v798_v14 = vmul.f32 -0.001358992, %v797_v12  ;;  %v805_v39 = vmul.f32 -0.00019511016, %v797_v12  ;;  %v1013_v18 = vshrl.u32 %v1510_v44, %v2063_v21  ;;  %v1015_v46 = vshll.u32 %v1510_v44, %v1000_v54 }
  0xac   : > { %v2081_v38 = vshrl.u32 %v922_v26, 30  ;;  %v2085_v43 = vor.u32 %v1004_v50, %v1003_v30  ;;  %v1016_v16 = vshrl.u32 %v1512_v59, %v2063_v21  ;;  %v2091_v28 = vor.u32 %v1007_v23, %v1006_v55 }
  0xad   : > { %v799_v25 = vadd.f32 0.041655596, %v798_v14  ;;  %v806_v9 = vadd.f32 0.008332121, %v805_v39  ;;  %v1014_v57 = vor.u32 %v1013_v18, %v1012_v17  ;;  %v1011_v11 = vor.u32 %v1010_v22, %v1009_v10 }
  0xae   : > { %v924_v52 = vshll.u32 %v2081_v38, 30  ;;  %v1017_v56 = vor.u32 %v1016_v16, %v1015_v46  ;;  %vm1018_vm10 = vcmp.lt.s32.totalorder %v2074_v8, 1  ;;  %vm1021_vm11 = vcmp.lt.s32.totalorder %v2074_v8, 4 }
  0xaf   : > { %v800_v19 = vmul.f32 %v799_v25, %v797_v12  ;;  %v807_v41 = vmul.f32 %v806_v9, %v797_v12  ;;  %vm1020_vm12 = vcmp.lt.s32.totalorder %v2074_v8, 3  ;;  %v1027_v61 = vsel %vm1021_vm11, %v1014_v57, 920167782 }
  0xb0   : > { %v925_v63 = vsub.s32 %v921_v35, %v924_v52  ;;  %v2099_v58 = vshll.u32 %v994_v62, 8  ;;  %v1140_v0 = vand.u32 2147483647, %v2051_v1  ;;  %v1431_v5 = vadd.s32 4294967169, %v1144_v45 }
  0xb1   : > { %v801_v51 = vadd.f32 -0.4999988, %v800_v19  ;;  %v808_v33 = vadd.f32 -0.16666654, %v807_v41  ;;  %vm1019_vm14 = vcmp.lt.s32.totalorder %v2074_v8, 2  ;;  %v1026_v7 = vsel %vm1018_vm10, %v2085_v43, %v2091_v28 }
  0xb2   : > { %vm926_vm13 = vcmp.lt.s32.totalorder %v925_v63, 0  ;;  %v927_v29 = vsub.s32 0, %v925_v63  ;;  %v1028_v31 = vsel %vm1020_vm12, %v1011_v11, %v1027_v61  ;;  %v1031_v54 = vsel %vm1021_vm11, %v1017_v56, 1326507024 }
  0xb3   : > { %v802_v60 = vmul.f32 %v801_v51, %v797_v12  ;;  %v809_v37 = vmul.f32 %v808_v33, %v797_v12  ;;  %v1030_v14 = vsel %vm1018_vm10, %v2091_v28, %v1011_v11  ;;  %v917_v39 = vadd.s32 %v2045_v27, %v2043_v32 }
  0xb4   : > { %v928_v62 = vsel %vm926_vm13, %v927_v29, %v925_v63  ;;  %v2118_v6 = vand.u32 8388607, %v1140_v0  ;;  %v2120_v30 = vadd.s32 1, %v1431_v5  ;;  %v1032_v55 = vsel %vm1020_vm12, %v1014_v57, %v1031_v54 }
  0xb5   : > { %v803_v3 = vadd.f32 1.0, %v802_v60  ;;  %v810_v24 = vadd.f32 1.0, %v809_v37  ;;  %v929_v35 = vclz %v928_v62  ;;  %v1035_v23 = vand.u32 65535, %v2099_v58 }
  0xb6   : > { %v1029_v32 = vsel %vm1019_vm14, %v1026_v7, %v1028_v31  ;;  %v1033_v27 = vsel %vm1019_vm14, %v1030_v14, %v1032_v55  ;;  %v1036_v9 = vshrl.u32 %v2099_v58, 16  ;;  %v1002_v17 = vshrl.u32 %v1506_v34, %v2063_v21 }
  0xb7   : > { %v811_v12 = vmul.f32 %v810_v24, %v795_v47  ;;  %v819_v13 = vxor.u32 2147483648, %v803_v3  ;;  %v1422_v25 = vadd.s32 4294967294, %v929_v35  ;;  %v1037_v10 = vand.u32 65535, %v1033_v27 }
  0xb8   : > { %v1038_v22 = vshrl.u32 %v1033_v27, 16  ;;  %vm825_vm15 = vcmp.lt.s32.totalorder %v1789_v48, 0  ;;  %v1059_v19 = vand.u32 65535, %v1029_v32  ;;  %vm1151_vm1 = vcmp.gt.s32.totalorder %v2120_v30, 0 }
  0xb9   : > { %v816_v50 = vxor.u32 2147483648, %v811_v12  ;;  %v820_v47 = vsel %vm818_vm6, %v819_v13, %v811_v12  ;;  %vm1423_vm0 = vcmp.lt.s32.totalorder %v1422_v25, 0  ;;  %v1060_v16 = vshrl.u32 %v1029_v32, 16 }
  0xba   : > { %v932_v46 = vsel %vm1423_vm0, 0, %v1422_v25  ;;  %v1040_v57 = vmul.u32 %v1038_v22, %v1035_v23  ;;  %v1039_v33 = vmul.u32 %v1037_v10, %v1035_v23  ;;  %v947_v4 = vsub.s32 4, %v2081_v38 }
  0xbb   : > { %v817_v26 = vsel %vm815_vm7, %v803_v3, %v816_v50  ;;  %v933_v45 = vsub.s32 32, %v932_v46  ;;  %v934_v51 = vshll.u32 %v925_v63, %v932_v46  ;;  %v937_v21 = vsub.s32 4294967266, %v932_v46 }
  0xbc   : > { %v821_v18 = vsel %vm814_vm8, %v817_v26, %v820_v47  ;;  %v1022_v52 = vsel %vm1018_vm10, %v1002_v17, %v2085_v43  ;;  %v1023_v56 = vsel %vm1021_vm11, %v1011_v11, 2102212464  ;;  %v1041_v49 = vmul.u32 %v1037_v10, %v1036_v9 }
  0xbd   : > { %v822_v41 = vsel %vm812_vm9, nan, %v821_v18  ;;  %vm2152_vm3 = vcmp.le.f32.partialorder %v823_v20, 0.7853982  ;;  %v935_v37 = vshrl.u32 %v917_v39, %v933_v45  ;;  %v938_v63 = vadd.s32 127, %v937_v21 }
  0xbe   : > { %977 = vst.msk [vmem:[%s1899_s10 + $0x20] sm:$0xff] %vm270_vm2, %v822_v41  ;;  %v1042_v61 = vmul.u32 %v1038_v22, %v1036_v9  ;;  %v1043_v5 = vshll.u32 %v1040_v57, 16  ;;  %v1045_v3 = vshll.u32 %v1041_v49, 16  ;;  %v1061_v24 = vmul.u32 %v1059_v19, %v1035_v23 }
  0xbf   : > { %v1062_v29 = vmul.u32 %v1060_v16, %v1035_v23  ;;  %v1063_v7 = vmul.u32 %v1059_v19, %v1036_v9  ;;  %v936_v31 = vor.u32 %v935_v37, %v934_v51  ;;  %v939_v43 = vshll.u32 %v938_v63, 23 }
  0xc0   : > { %vm1047_vm4 = vc.u32 %v1039_v33, %v1043_v5  ;;  %v1049_v54 = vadd.s32 %v1043_v5, %v1039_v33  ;;  %v1044_v11 = vshrl.u32 %v1040_v57, 16  ;;  %v1064_v13 = vmul.u32 %v1060_v16, %v1036_v9 }
  0xc1   : > { %v1048_v12 = vsel %vm1047_vm4, 1, %v1505_v2  ;;  %v1065_v20 = vshll.u32 %v1062_v29, 16  ;;  %v940_v62 = vor.u32 4788187, %v939_v43  ;;  %v943_v14 = vcvt.s32.f32 %v936_v31 }
  0xc2   : > { %v1050_v35 = vadd.s32 %v1048_v12, %v1042_v61  ;;  %vm1051_vm5 = vc.u32 %v1049_v54, %v1045_v3  ;;  %v948_v39 = vsel %vm825_vm15, %v947_v4, %v2081_v38  ;;  %v1067_v47 = vshll.u32 %v1063_v7, 16 }
  0xc3   : > { %v1052_v50 = vsel %vm1051_vm5, 1, %v1505_v2  ;;  %vm1069_vm6 = vc.u32 %v1061_v24, %v1065_v20  ;;  %v941_v55 = vand.u32 2147483647, %v940_v62  ;;  %v1071_v32 = vadd.s32 %v1065_v20, %v1061_v24 }
  0xc4   : > { %v1054_v23 = vadd.s32 %v1052_v50, %v1050_v35  ;;  %v1070_v25 = vsel %vm1069_vm6, 1, %v1505_v2  ;;  %v1024_v27 = vsel %vm1020_vm12, %v2091_v28, %v1023_v56  ;;  %v1046_v9 = vshrl.u32 %v1041_v49, 16 }
  0xc5   : > { %v1072_v26 = vadd.s32 %v1070_v25, %v1064_v13  ;;  %v1152_v17 = vsel %vm1151_vm1, %v2120_v30, 0  ;;  %v944_v38 = vmul.f32 %v943_v14, %v941_v55  ;;  %v1066_v22 = vshrl.u32 %v1062_v29, 16 }
  0xc6   : > { %v1055_v10 = vadd.s32 %v1054_v23, %v1044_v11  ;;  %vm1073_vm7 = vc.u32 %v1071_v32, %v1067_v47  ;;  %v950_v18 = vsel %vm2152_vm3, 0, %v948_v39  ;;  %v1148_v41 = vor.u32 8388608, %v2118_v6 }
  0xc7   : > { %v1074_v19 = vsel %vm1073_vm7, 1, %v1505_v2  ;;  %v1154_v46 = vand.u32 31, %v1152_v17  ;;  %v945_v57 = vxor.u32 2147483648, %v944_v38  ;;  %v1025_v28 = vsel %vm1019_vm14, %v1022_v52, %v1024_v27 }
  0xc8   : > { %v1068_v16 = vshrl.u32 %v1063_v7, 16  ;;  %v1076_v45 = vadd.s32 %v1074_v19, %v1072_v26  ;;  %v2174_v51 = vadd.s32 %v1055_v10, %v1046_v9  ;;  %v2176_v30 = vadd.s32 %v1071_v32, %v1067_v47 }
  0xc9   : > { %v2178_v21 = vsub.s32 32, %v1154_v46  ;;  %v1157_v33 = vshll.u32 %v1506_v34, %v1154_v46  ;;  %v946_v4 = vsel %vm825_vm15, %v945_v57, %v944_v38  ;;  %v2183_v6 = vshrl.u32 %v1152_v17, 5 }
  0xca   : > { %v1077_v56 = vadd.s32 %v1076_v45, %v1066_v22  ;;  %v1160_v49 = vshll.u32 %v1507_v36, %v1154_v46  ;;  %v949_v8 = vsel %vm2152_vm3, %v1789_v48, %v946_v4  ;;  %v1163_v63 = vshll.u32 %v1508_v40, %v1154_v46 }
  0xcb   : > { %v1158_v52 = vshrl.u32 %v1507_v36, %v2178_v21  ;;  %v1161_v37 = vshrl.u32 %v1508_v40, %v2178_v21  ;;  %v951_v61 = vmul.f32 %v949_v8, %v949_v8  ;;  %v1164_v3 = vshrl.u32 %v1509_v42, %v2178_v21 }
  0xcc   : > { %v1078_v5 = vadd.s32 %v1077_v56, %v1068_v16  ;;  %v1166_v24 = vshll.u32 %v1509_v42, %v1154_v46  ;;  %v1079_v29 = vmul.u32 %v2099_v58, %v1025_v28  ;;  %vm1081_vm8 = vc.u32 %v2174_v51, %v2176_v30 }
  0xcd   : > { %v2200_v60 = vor.u32 %v1158_v52, %v1157_v33  ;;  %v1167_v36 = vshrl.u32 %v1510_v44, %v2178_v21  ;;  %v952_v7 = vmul.f32 -0.001358992, %v951_v61  ;;  %v959_v31 = vmul.f32 -0.00019511016, %v951_v61 }
  0xce   : > { %v1082_v40 = vadd.s32 1, %v1078_v5  ;;  %v1169_v43 = vshll.u32 %v1510_v44, %v1154_v46  ;;  %v2205_v54 = vor.u32 %v1161_v37, %v1160_v49  ;;  %v2207_v11 = vor.u32 %v1164_v3, %v1163_v63 }
  0xcf   : > { %v1168_v42 = vor.u32 %v1167_v36, %v1166_v24  ;;  %v1170_v58 = vshrl.u32 %v1512_v59, %v2178_v21  ;;  %v953_v12 = vadd.f32 0.041655596, %v952_v7  ;;  %v960_v13 = vadd.f32 0.008332121, %v959_v31 }
  0xd0   : > { %v1083_v20 = vsel %vm1081_vm8, %v1082_v40, %v1078_v5  ;;  %vm1172_vm9 = vcmp.lt.s32.totalorder %v2183_v6, 1  ;;  %v967_v62 = vand.u32 3, %v950_v18  ;;  %vm1174_vm10 = vcmp.lt.s32.totalorder %v2183_v6, 3 }
  0xd1   : > { %v1084_v14 = vadd.s32 %v1083_v20, %v1079_v29  ;;  %vm1175_vm11 = vcmp.lt.s32.totalorder %v2183_v6, 4  ;;  %v954_v44 = vmul.f32 %v953_v12, %v951_v61  ;;  %v961_v35 = vmul.f32 %v960_v13, %v951_v61 }
  0xd2   : > { %v1171_v39 = vor.u32 %v1170_v58, %v1169_v43  ;;  %vm1173_vm12 = vcmp.lt.s32.totalorder %v2183_v6, 2  ;;  %v1180_v59 = vsel %vm1172_vm9, %v2200_v60, %v2205_v54  ;;  %v1181_v47 = vsel %vm1175_vm11, %v1168_v42, 920167782 }
  0xd3   : > { %v1085_v50 = vadd.s32 536870912, %v1084_v14  ;;  %v2221_v55 = vshll.u32 %v1148_v41, 8  ;;  %v955_v23 = vadd.f32 -0.4999988, %v954_v44  ;;  %v962_v25 = vadd.f32 -0.16666654, %v961_v35 }
  0xd4   : > { %v1182_v32 = vsel %vm1174_vm10, %v2207_v11, %v1181_v47  ;;  %v1184_v26 = vsel %vm1172_vm9, %v2205_v54, %v2207_v11  ;;  %vm968_vm13 = vcmp.lt.s32.totalorder %v967_v62, 2  ;;  %v1185_v10 = vsel %vm1175_vm11, %v1171_v39, 1326507024 }
  0xd5   : > { %v2226_v27 = vshrl.u32 %v1085_v50, 30  ;;  %v1183_v9 = vsel %vm1173_vm12, %v1180_v59, %v1182_v32  ;;  %v956_v17 = vmul.f32 %v955_v23, %v951_v61  ;;  %v963_v38 = vmul.f32 %v962_v25, %v951_v61 }
  0xd6   : > { %v1186_v18 = vsel %vm1174_vm10, %v1168_v42, %v1185_v10  ;;  %v1189_v19 = vand.u32 65535, %v2221_v55  ;;  %v1190_v41 = vshrl.u32 %v2221_v55, 16  ;;  %v1214_v16 = vshrl.u32 %v1183_v9, 16 }
  0xd7   : > { %v1087_v22 = vshll.u32 %v2226_v27, 30  ;;  %v957_v46 = vadd.f32 1.0, %v956_v17  ;;  %v964_v57 = vadd.f32 1.0, %v963_v38  ;;  %v1187_v28 = vsel %vm1173_vm12, %v1184_v26, %v1186_v18 }
  0xd8   : > { %vm972_vm14 = vcmp.eq.s32.totalorder %v967_v62, 2  ;;  %v1191_v33 = vand.u32 65535, %v1187_v28  ;;  %v1192_v4 = vshrl.u32 %v1187_v28, 16  ;;  %vm969_vm15 = vcmp.eq.s32.totalorder %v967_v62, 0 }
  0xd9   : > { %v1088_v45 = vsub.s32 %v1084_v14, %v1087_v22  ;;  %v965_v56 = vmul.f32 %v964_v57, %v949_v8  ;;  %v973_v49 = vxor.u32 2147483648, %v957_v46  ;;  %v1213_v52 = vand.u32 65535, %v1183_v9 }
  0xda   : > { %v1193_v63 = vmul.u32 %v1191_v33, %v1189_v19  ;;  %v1194_v61 = vmul.u32 %v1192_v4, %v1189_v19  ;;  %v1195_v24 = vmul.u32 %v1191_v33, %v1190_v41  ;;  %v1216_v29 = vmul.u32 %v1214_v16, %v1189_v19 }
  0xdb   : > { %vm1089_vm0 = vcmp.lt.s32.totalorder %v1088_v45, 0  ;;  %v1090_v37 = vsub.s32 0, %v1088_v45  ;;  %v970_v5 = vxor.u32 2147483648, %v965_v56  ;;  %v974_v3 = vsel %vm972_vm14, %v973_v49, %v965_v56 }
  0xdc   : > { %vm966_vm1 = vweird.f32 %v1789_v48  ;;  %v1196_v7 = vmul.u32 %v1192_v4, %v1190_v41  ;;  %v1197_v31 = vshll.u32 %v1194_v61, 16  ;;  %v1199_v8 = vshll.u32 %v1195_v24, 16 }
  0xdd   : > { %v1091_v36 = vsel %vm1089_vm0, %v1090_v37, %v1088_v45  ;;  %v971_v40 = vsel %vm969_vm15, %v957_v46, %v970_v5  ;;  %v1215_v42 = vmul.u32 %v1213_v52, %v1189_v19  ;;  %v1217_v13 = vmul.u32 %v1213_v52, %v1190_v41 }
  0xde   : > { %v1092_v43 = vclz %v1091_v36  ;;  %v975_v58 = vsel %vm968_vm13, %v971_v40, %v974_v3  ;;  %vm1201_vm3 = vc.u32 %v1193_v63, %v1197_v31  ;;  %v1203_v12 = vadd.s32 %v1197_v31, %v1193_v63 }
  0xdf   : > { %v976_v20 = vsel %vm966_vm1, nan, %v975_v58  ;;  %v1202_v44 = vsel %vm1201_vm3, 1, %v1505_v2  ;;  %v1219_v35 = vshll.u32 %v1216_v29, 16  ;;  %v1080_v39 = vadd.s32 %v2176_v30, %v2174_v51 }
  0xe0   : > { %v1429_v14 = vadd.s32 4294967294, %v1092_v43  ;;  %978 = vst.msk [vmem:[%s1899_s10 + $0x28] sm:$0xff] %vm270_vm2, %v976_v20  ;;  %v1204_v48 = vadd.s32 %v1202_v44, %v1196_v7  ;;  %vm1205_vm4 = vc.u32 %v1203_v12, %v1199_v8  ;;  %v1218_v62 = vmul.u32 %v1214_v16, %v1190_v41 }
  0xe1   : > { %v1206_v50 = vsel %vm1205_vm4, 1, %v1505_v2  ;;  %v1198_v47 = vshrl.u32 %v1194_v61, 16  ;;  %vm1223_vm6 = vc.u32 %v1215_v42, %v1219_v35  ;;  %v1221_v26 = vshll.u32 %v1217_v13, 16 }
  0xe2   : > { %vm1430_vm5 = vcmp.lt.s32.totalorder %v1429_v14, 0  ;;  %v1208_v23 = vadd.s32 %v1206_v50, %v1204_v48  ;;  %v1156_v17 = vshrl.u32 %v1506_v34, %v2178_v21  ;;  %v1177_v38 = vsel %vm1175_vm11, %v2207_v11, 2102212464 }
  0xe3   : > { %v1095_v59 = vsel %vm1430_vm5, 0, %v1429_v14  ;;  %v1224_v51 = vsel %vm1223_vm6, 1, %v1505_v2  ;;  %v1225_v22 = vadd.s32 %v1219_v35, %v1215_v42  ;;  %v1200_v19 = vshrl.u32 %v1195_v24, 16 }
  0xe4   : > { %v1096_v25 = vsub.s32 32, %v1095_v59  ;;  %v1097_v32 = vshll.u32 %v1088_v45, %v1095_v59  ;;  %v1100_v9 = vsub.s32 4294967266, %v1095_v59  ;;  %v1226_v18 = vadd.s32 %v1224_v51, %v1218_v62 }
  0xe5   : > { %v1209_v41 = vadd.s32 %v1208_v23, %v1198_v47  ;;  %v1220_v28 = vshrl.u32 %v1216_v29, 16  ;;  %vm1227_vm7 = vc.u32 %v1225_v22, %v1221_v26  ;;  %v1176_v34 = vsel %vm1172_vm9, %v1156_v17, %v2200_v60 }
  0xe6   : > { %v1098_v30 = vshrl.u32 %v1080_v39, %v1096_v25  ;;  %v1101_v10 = vadd.s32 127, %v1100_v9  ;;  %v1178_v21 = vsel %vm1174_vm10, %v2205_v54, %v1177_v38  ;;  %v1228_v11 = vsel %vm1227_vm7, 1, %v1505_v2 }
  0xe7   : > { %v1222_v33 = vshrl.u32 %v1217_v13, 16  ;;  %v1230_v4 = vadd.s32 %v1228_v11, %v1226_v18  ;;  %v1210_v56 = vadd.s32 %v1209_v41, %v1200_v19  ;;  %v1229_v49 = vadd.s32 %v1225_v22, %v1221_v26 }
  0xe8   : > { %v1099_v46 = vor.u32 %v1098_v30, %v1097_v32  ;;  %v1102_v57 = vshll.u32 %v1101_v10, 23  ;;  %v1179_v37 = vsel %vm1173_vm12, %v1176_v34, %v1178_v21  ;;  %vm988_vm8 = vcmp.lt.s32.totalorder %v2017_v15, 0 }
  0xe9   : > { %v1231_v63 = vadd.s32 %v1230_v4, %v1220_v28  ;;  %v1233_v60 = vmul.u32 %v2221_v55, %v1179_v37  ;;  %vm1235_vm9 = vc.u32 %v1210_v56, %v1229_v49  ;;  %vm2270_vm10 = vcmp.le.f32.partialorder %v986_v53, 0.7853982 }
  0xea   : > { %v1103_v16 = vor.u32 4788187, %v1102_v57  ;;  %v1106_v45 = vcvt.s32.f32 %v1099_v46  ;;  %v1110_v6 = vsub.s32 4, %v2226_v27  ;;  %v1234_v51 = vadd.s32 %v1229_v49, %v1210_v56 }
  0xeb   : > { %v1232_v5 = vadd.s32 %v1231_v63, %v1222_v33  ;;  %vm1129_vm0 = vweird.f32 %v2017_v15  ;;  %vm1142_vm1 = vcmp.lt.s32.totalorder %v2051_v1, 0  ;;  %vm2287_vm3 = vcmp.le.f32.partialorder %v1140_v0, 0.7853982 }
  0xec   : > { %v1104_v52 = vand.u32 2147483647, %v1103_v16  ;;  %v1111_v53 = vsel %vm988_vm8, %v1110_v6, %v2226_v27  ;;  %vm1283_vm7 = vweird.f32 %v2051_v1 }
  0xed   : > { %v1236_v3 = vadd.s32 1, %v1232_v5  ;;  %v1113_v13 = vsel %vm2270_vm10, 0, %v1111_v53 }
  0xee   : > { %v1107_v61 = vmul.f32 %v1106_v45, %v1104_v52  ;;  %v1130_v39 = vand.u32 3, %v1113_v13 }
  0xef   : > { %v1237_v29 = vsel %vm1235_vm9, %v1236_v3, %v1232_v5 }
  0xf0   : > { %v1108_v54 = vxor.u32 2147483648, %v1107_v61  ;;  %v1238_v7 = vadd.s32 %v1237_v29, %v1233_v60  ;;  %vm1135_vm12 = vcmp.eq.s32.totalorder %v1130_v39, 2  ;;  %vm1131_vm13 = vcmp.lt.s32.totalorder %v1130_v39, 2 }
  0xf1   : > { %vm1132_vm14 = vcmp.eq.s32.totalorder %v1130_v39, 0 }
  0xf2   : > { %v1109_v24 = vsel %vm988_vm8, %v1108_v54, %v1107_v61  ;;  %v1239_v55 = vadd.s32 536870912, %v1238_v7 }
  0xf3   : > { %v1112_v36 = vsel %vm2270_vm10, %v2017_v15, %v1109_v24 }
  0xf4   : > { %v1114_v31 = vmul.f32 %v1112_v36, %v1112_v36  ;;  %v1240_v8 = vshrl.u32 %v1239_v55, 30 }
  0xf6   : > { %v1115_v40 = vmul.f32 -0.001358992, %v1114_v31  ;;  %v1122_v43 = vmul.f32 -0.00019511016, %v1114_v31  ;;  %v1241_v12 = vshll.u32 %v1240_v8, 30  ;;  %v1264_v49 = vsub.s32 4, %v1240_v8 }
  0xf8   : > { %v1116_v42 = vadd.f32 0.041655596, %v1115_v40  ;;  %v1123_v58 = vadd.f32 0.008332121, %v1122_v43  ;;  %v1242_v44 = vsub.s32 %v1238_v7, %v1241_v12  ;;  %v1265_v5 = vsel %vm1142_vm1, %v1264_v49, %v1240_v8 }
  0xf9   : > { %v1267_v54 = vsel %vm2287_vm3, 0, %v1265_v5 }
  0xfa   : > { %v1117_v20 = vmul.f32 %v1116_v42, %v1114_v31  ;;  %v1124_v14 = vmul.f32 %v1123_v58, %v1114_v31  ;;  %vm1243_vm11 = vcmp.lt.s32.totalorder %v1242_v44, 0  ;;  %v1244_v50 = vsub.s32 0, %v1242_v44 }
  0xfb   : > { %v1284_v6 = vand.u32 3, %v1267_v54 }
  0xfc   : > { %v1118_v35 = vadd.f32 -0.4999988, %v1117_v20  ;;  %v1125_v48 = vadd.f32 -0.16666654, %v1124_v14  ;;  %v1245_v47 = vsel %vm1243_vm11, %v1244_v50, %v1242_v44 }
  0xfd   : > { %v1246_v25 = vclz %v1245_v47  ;;  %vm1289_vm4 = vcmp.eq.s32.totalorder %v1284_v6, 2  ;;  %vm1286_vm5 = vcmp.eq.s32.totalorder %v1284_v6, 0  ;;  %vm1285_vm6 = vcmp.lt.s32.totalorder %v1284_v6, 2 }
  0xfe   : > { %v1119_v62 = vmul.f32 %v1118_v35, %v1114_v31  ;;  %v1126_v59 = vmul.f32 %v1125_v48, %v1114_v31 }
  0xff   : > { %v1432_v26 = vadd.s32 4294967294, %v1246_v25 }
 0x100   : > { %v1120_v23 = vadd.f32 1.0, %v1119_v62  ;;  %v1127_v27 = vadd.f32 1.0, %v1126_v59 }
 0x101   : > { %vm1433_vm15 = vcmp.lt.s32.totalorder %v1432_v26, 0 }
 0x102   : > { %v1128_v32 = vmul.f32 %v1127_v27, %v1112_v36  ;;  %v1136_v9 = vxor.u32 2147483648, %v1120_v23  ;;  %v1249_v30 = vsel %vm1433_vm15, 0, %v1432_v26 }
 0x103   : > { %v1250_v22 = vsub.s32 32, %v1249_v30  ;;  %v1251_v18 = vshll.u32 %v1242_v44, %v1249_v30  ;;  %v1254_v19 = vsub.s32 4294967266, %v1249_v30 }
 0x104   : > { %v1133_v17 = vxor.u32 2147483648, %v1128_v32  ;;  %v1137_v38 = vsel %vm1135_vm12, %v1136_v9, %v1128_v32 }
 0x105   : > { %v1252_v57 = vshrl.u32 %v1234_v51, %v1250_v22  ;;  %v1255_v28 = vadd.s32 127, %v1254_v19 }
 0x106   : > { %v1134_v10 = vsel %vm1132_vm14, %v1120_v23, %v1133_v17 }
 0x107   : > { %v1138_v41 = vsel %vm1131_vm13, %v1134_v10, %v1137_v38  ;;  %v1253_v34 = vor.u32 %v1252_v57, %v1251_v18  ;;  %v1256_v21 = vshll.u32 %v1255_v28, 23 }
 0x108   : > { %v1139_v46 = vsel %vm1129_vm0, nan, %v1138_v41 }
 0x109   : > { %1294 = vst.msk [vmem:[%s1899_s10 + $0x30] sm:$0xff] %vm270_vm2, %v1139_v46  ;;  %v1257_v11 = vor.u32 4788187, %v1256_v21  ;;  %v1260_v16 = vcvt.s32.f32 %v1253_v34 }
 0x10b   : > { %v1258_v45 = vand.u32 2147483647, %v1257_v11 }
 0x10d   : > { %v1261_v33 = vmul.f32 %v1260_v16, %v1258_v45 }
 0x10f   : > { %v1262_v4 = vxor.u32 2147483648, %v1261_v33 }
 0x111   : > { %v1263_v56 = vsel %vm1142_vm1, %v1262_v4, %v1261_v33 }
 0x112   : > { %v1266_v52 = vsel %vm2287_vm3, %v2051_v1, %v1263_v56 }
 0x113   : > { %v1268_v37 = vmul.f32 %v1266_v52, %v1266_v52 }
 0x115   : > { %v1269_v63 = vmul.f32 -0.001358992, %v1268_v37  ;;  %v1276_v61 = vmul.f32 -0.00019511016, %v1268_v37 }
 0x117   : > { %v1270_v60 = vadd.f32 0.041655596, %v1269_v63  ;;  %v1277_v2 = vadd.f32 0.008332121, %v1276_v61 }
 0x119   : > { %v1271_v0 = vmul.f32 %v1270_v60, %v1268_v37  ;;  %v1278_v3 = vmul.f32 %v1277_v2, %v1268_v37 }
 0x11b   : > { %v1272_v24 = vadd.f32 -0.4999988, %v1271_v0  ;;  %v1279_v29 = vadd.f32 -0.16666654, %v1278_v3 }
 0x11d   : > { %v1273_v36 = vmul.f32 %v1272_v24, %v1268_v37  ;;  %v1280_v7 = vmul.f32 %v1279_v29, %v1268_v37 }
 0x11f   : > { %v1274_v31 = vadd.f32 1.0, %v1273_v36  ;;  %v1281_v55 = vadd.f32 1.0, %v1280_v7 }
 0x121   : > { %v1282_v40 = vmul.f32 %v1281_v55, %v1266_v52  ;;  %v1290_v43 = vxor.u32 2147483648, %v1274_v31 }
 0x123   : > { %v1287_v53 = vxor.u32 2147483648, %v1282_v40  ;;  %v1291_v8 = vsel %vm1289_vm4, %v1290_v43, %v1282_v40 }
 0x125   : > { %v1288_v42 = vsel %vm1286_vm5, %v1274_v31, %v1287_v53 }
 0x126   : > { %v1292_v58 = vsel %vm1285_vm6, %v1288_v42, %v1291_v8 }
 0x127   : > { %v1293_v12 = vsel %vm1283_vm7, nan, %v1292_v58 }
 0x128   : > { %1295 = vst.msk [vmem:[%s1899_s10 + $0x38] sm:$0xff] %vm270_vm2, %v1293_v12 }
 0x129 PF: > { %s14_s17 = sadd.s32 1, %s1503_s17   ;;  %s2323_s15 = smov %s1499_s16 }
 0x12a   : > { %p11_p5 = scmp.ge.s32.totalorder %s14_s17, 4   ;;  %s2324_s16 = smov %s2326_s18 }
 0x12c   :  { %13 = sbr.rel (!%p11_p5) target bundleno = 2 (0x2), region = 72 }

</bundles_post_ra>
